<compile_context>
chip_gen: v6e
topology: v6e:2x2x1
jax: 0.10.0
libtpu: 0.0.40
codegen_flags: <defaults>
</compile_context>

<pallas_src>
import jax
import jax.numpy as jnp
from jax.experimental import pallas as pl
from jax.experimental.pallas import tpu as pltpu


def _round_up(n: int, m: int) -> int:
    return ((n + m - 1) // m) * m


def _discriminator_kernel(x_ref, w1_ref, b1_ref, w2_ref, b2_ref,
                          w3_ref, b3_ref, o_ref):
    # In-kernel bf16 cast: rides idle VPU slots under the MXU and avoids a
    # separate wrapper-side HBM convert pass over the images.
    x = x_ref[...].astype(jnp.bfloat16)

    # Layer 1: Linear(F, 512) + LeakyReLU(0.2) -- bf16 MXU matmul, f32 accumulate.
    h1 = jnp.dot(x, w1_ref[...], preferred_element_type=jnp.float32) + b1_ref[...]
    h1 = jnp.maximum(h1, 0.2 * h1)

    # Layer 2: Linear(512, 256) + LeakyReLU(0.2).
    h2 = jnp.dot(h1.astype(jnp.bfloat16), w2_ref[...],
                 preferred_element_type=jnp.float32) + b2_ref[...]
    h2 = jnp.maximum(h2, 0.2 * h2)

    # Layer 3: Linear(256, 1) + Sigmoid, emitted lane-dense.
    # w3 is an (8, 256) slab (row 0 = real weights, rest zero) contracted with
    # h2 over the feature dim via a trans-B dot (same dimension numbers as
    # q @ k^T in flash attention), so the result lands batch-on-lanes:
    # unmasked vector stores and few vregs through the EUP sigmoid.
    z = jax.lax.dot_general(
        w3_ref[...], h2.astype(jnp.bfloat16),
        dimension_numbers=(((1,), (1,)), ((), ())),
        preferred_element_type=jnp.float32)              # (8, TILE_B)
    o_ref[...] = jax.nn.sigmoid(z[0:1, :] + b3_ref[0, 0]).astype(o_ref.dtype)


def discriminator_forward(img, params, *, tile_b_max=2048):
    """img: (B, C, H, W) float32. Returns validity (B, 1) float32."""
    w1, b1, w2, b2, w3, b3 = params
    B = int(img.shape[0])
    F = 1
    for d in img.shape[1:]:
        F *= int(d)
    n1 = int(w1.shape[1])   # 512
    n2 = int(w2.shape[1])   # 256

    # Same semantics as torch .view(B, -1) on a contiguous NCHW tensor.
    # No padding and no dtype pre-pass: f32 goes straight into the kernel.
    x_flat = img.reshape(B, F).astype(jnp.float32)

    # --- batch tile selection -------------------------------------------------
    tile_b = min(int(tile_b_max), _round_up(B, 8))
    # v7x has 2 TensorCores: keep >= 2 grid steps when the batch allows so
    # dimension_semantics=("parallel",) actually spans both cores.
    if B > 8 and pl.cdiv(B, tile_b) < 2:
        tile_b = _round_up(pl.cdiv(B, 2), 8)

    # VMEM budget: double-buffered x blocks + resident weights (x2 buffering)
    # + output blocks + in-kernel temps. Shrink the tile if it would overflow
    # the smallest generation (v7x: 64 MiB physical).
    def vmem_bytes(tb):
        return (2 * tb * F * 4                  # x f32 blocks (double-buffered)
                + 2 * F * n1 * 2                # w1 bf16
                + 2 * n1 * n2 * 2               # w2 bf16
                + 2 * (n1 + n2 + 8 * n2) * 4    # b1, b2, w3 slab
                + 2 * tb * 4                    # (1, tile_b) output blocks
                + tb * F * 2                    # x bf16 temp
                + tb * n1 * 6                   # h1 f32 + bf16
                + tb * n2 * 4)                  # h2 f32

    VMEM_CAP = 56 << 20     # safe under v7x's 64 MiB; v5e/v6e have 128 MiB
    while tile_b > 8 and vmem_bytes(tile_b) > VMEM_CAP:
        tile_b = max(8, _round_up(tile_b // 2, 8))
    # TODO(synk): for very large img_shape (F >~ 16k on v7x) add a K grid axis
    # over F with an f32 accumulator scratch instead of only shrinking tile_b.

    n_tiles = int(pl.cdiv(B, tile_b))
    b_total = n_tiles * tile_b
    vmem_limit = int(min(VMEM_CAP, vmem_bytes(tile_b) + (4 << 20)))

    # Weight prep (tiny, done once): bf16 matmul operands, f32 biases.
    w1_bf = w1.astype(jnp.bfloat16)
    w2_bf = w2.astype(jnp.bfloat16)
    w3_slab = jnp.zeros((8, n2), jnp.bfloat16).at[0, :].set(
        w3.reshape(n2).astype(jnp.bfloat16))           # (256,1) -> (8,256) slab
    b1_row = b1.reshape(1, n1).astype(jnp.float32)
    b2_row = b2.reshape(1, n2).astype(jnp.float32)
    b3_sc = b3.reshape(1, 1).astype(jnp.float32)

    flops = 2 * b_total * (F * n1 + n1 * n2 + n2)
    bytes_accessed = (B * F * 4 + F * n1 * 2 + n1 * n2 * 2
                      + (n1 + n2 + 1) * 4 + 8 * n2 * 2 + b_total * 4)

    out = pl.pallas_call(
        _discriminator_kernel,
        out_shape=jax.ShapeDtypeStruct((n_tiles, tile_b), jnp.float32),
        grid=(n_tiles,),
        in_specs=[
            pl.BlockSpec((tile_b, F), lambda i: (i, 0)),        # x batch tile (f32)
            pl.BlockSpec((F, n1), lambda i: (0, 0)),            # w1 (VMEM-resident)
            pl.BlockSpec((1, n1), lambda i: (0, 0)),            # b1
            pl.BlockSpec((n1, n2), lambda i: (0, 0)),           # w2
            pl.BlockSpec((1, n2), lambda i: (0, 0)),            # b2
            pl.BlockSpec((8, n2), lambda i: (0, 0)),            # w3 slab
            pl.BlockSpec((1, 1), lambda i: (0, 0),
                         memory_space=pltpu.MemorySpace.SMEM),  # b3 scalar
        ],
        out_specs=pl.BlockSpec((1, tile_b), lambda i: (i, 0)),  # lane-dense out
        compiler_params=pltpu.CompilerParams(
            dimension_semantics=("parallel",),
            vmem_limit_bytes=vmem_limit),
        cost_estimate=pl.CostEstimate(
            flops=flops, transcendentals=b_total,
            bytes_accessed=bytes_accessed),
    )(x_flat, w1_bf, b1_row, w2_bf, b2_row, w3_slab, b3_sc)

    # (n_tiles, tile_b) lane-dense -> (B, 1). Ragged tail rows (computed from
    # the partial last x block's unspecified padding) are sliced off here; rows
    # are independent, so they never affect kept outputs.
    return out.reshape(b_total, 1)[:B]


def init_params(key, in_features):
    """Deterministic init mimicking PyTorch nn.Linear default U[-1/sqrt(fan_in), ...]."""
    dims = [(in_features, 512), (512, 256), (256, 1)]
    params = []
    keys = jax.random.split(key, 2 * len(dims))
    for i, (fan_in, fan_out) in enumerate(dims):
        bound = 1.0 / jnp.sqrt(jnp.float32(fan_in))
        w = jax.random.uniform(keys[2 * i], (fan_in, fan_out),
                               minval=-bound, maxval=bound, dtype=jnp.float32)
        b = jax.random.uniform(keys[2 * i + 1], (1, fan_out),
                               minval=-bound, maxval=bound, dtype=jnp.float32)
        params += [w, b]
    return tuple(params)


def _reference_forward(img, params):
    """Plain-JAX f32 reference for correctness check."""
    w1, b1, w2, b2, w3, b3 = params
    x = img.reshape(img.shape[0], -1)
    h = x @ w1 + b1
    h = jnp.where(h > 0, h, 0.2 * h)
    h = h @ w2 + b2
    h = jnp.where(h > 0, h, 0.2 * h)
    h = h @ w3 + b3
    return jax.nn.sigmoid(h)


if __name__ == "__main__":
    key = jax.random.PRNGKey(0)
    k_img, k_params = jax.random.split(key)

    # Small example consistent with the module: img_shape = (C, H, W) = (4, 16, 16)
    B, C, H, W = 2, 4, 16, 16
    img = jax.random.normal(k_img, (B, C, H, W), dtype=jnp.float32)
    params = init_params(k_params, C * H * W)

    validity = discriminator_forward(img, params)
    validity = jax.block_until_ready(validity)

    ref = _reference_forward(img, params)
    assert validity.shape == (B, 1), validity.shape
    # bf16 matmul inputs (f32 accumulation) => looser tolerance than pure f32.
    assert jnp.max(jnp.abs(validity - ref)) < 2e-2, (
        "Pallas output mismatch vs reference")

    print("KERNEL_OK")
</pallas_src>

<mosaic_0001>
module attributes {stable_mosaic.version = 11 : i64} {
  func.func @_discriminator_kernel(%arg0: i32, %arg1: memref<8x1024xf32, #tpu.memory_space<vmem>>, %arg2: memref<1024x512xbf16, #tpu.memory_space<vmem>>, %arg3: memref<1x512xf32, #tpu.memory_space<vmem>>, %arg4: memref<512x256xbf16, #tpu.memory_space<vmem>>, %arg5: memref<1x256xf32, #tpu.memory_space<vmem>>, %arg6: memref<8x256xbf16, #tpu.memory_space<vmem>>, %arg7: memref<1x1xf32, #tpu.memory_space<smem>>, %arg8: memref<1x8xf32, #tpu.memory_space<vmem>>) attributes {dimension_semantics = [#tpu.dimension_semantics<parallel>], iteration_bounds = array<i64: 1>, scalar_prefetch = 0 : i64, scratch_operands = 0 : i64, tpu.core_type = #tpu.core_type<tc>, window_params = [{transform_indices = @transform_0, window_bounds = array<i64: 8, 1024>}, {pipeline_mode = #tpu.pipeline_mode<synchronous>, transform_indices = @transform_1, window_bounds = array<i64: 1024, 512>}, {pipeline_mode = #tpu.pipeline_mode<synchronous>, transform_indices = @transform_2, window_bounds = array<i64: 1, 512>}, {pipeline_mode = #tpu.pipeline_mode<synchronous>, transform_indices = @transform_3, window_bounds = array<i64: 512, 256>}, {pipeline_mode = #tpu.pipeline_mode<synchronous>, transform_indices = @transform_4, window_bounds = array<i64: 1, 256>}, {pipeline_mode = #tpu.pipeline_mode<synchronous>, transform_indices = @transform_5, window_bounds = array<i64: 8, 256>}, {transform_indices = @transform_6, window_bounds = array<i64: 1, 1>}, {transform_indices = @transform_7, window_bounds = array<i64: 1, 8>}]} {
    %c0 = arith.constant 0 : index
    %c0_0 = arith.constant 0 : index
    %0 = vector.load %arg1[%c0, %c0_0] : memref<8x1024xf32, #tpu.memory_space<vmem>>, vector<8x1024xf32>
    %1 = arith.truncf %0 : vector<8x1024xf32> to vector<8x1024xbf16>
    %c0_1 = arith.constant 0 : index
    %c0_2 = arith.constant 0 : index
    %2 = vector.load %arg2[%c0_1, %c0_2] : memref<1024x512xbf16, #tpu.memory_space<vmem>>, vector<1024x512xbf16>
    %cst = arith.constant dense<0.000000e+00> : vector<8x512xf32>
    %3 = tpu.matmul %1, %2, %cst {dimension_numbers = #tpu.dot_dimension_numbers<[1], [0], [0], [1], [0, 0, 1, 1], [], []>} : vector<8x1024xbf16>, vector<1024x512xbf16>, vector<8x512xf32> -> vector<8x512xf32>
    %c0_3 = arith.constant 0 : index
    %c0_4 = arith.constant 0 : index
    %4 = vector.load %arg3[%c0_3, %c0_4] : memref<1x512xf32, #tpu.memory_space<vmem>>, vector<1x512xf32>
    %5 = vector.broadcast %4 : vector<1x512xf32> to vector<8x512xf32>
    %6 = arith.addf %3, %5 : vector<8x512xf32>
    %cst_5 = arith.constant 2.000000e-01 : f32
    %7 = vector.broadcast %cst_5 : f32 to vector<8x512xf32>
    %8 = arith.mulf %7, %6 : vector<8x512xf32>
    %9 = arith.maximumf %6, %8 : vector<8x512xf32>
    %10 = arith.truncf %9 : vector<8x512xf32> to vector<8x512xbf16>
    %c0_6 = arith.constant 0 : index
    %c0_7 = arith.constant 0 : index
    %11 = vector.load %arg4[%c0_6, %c0_7] : memref<512x256xbf16, #tpu.memory_space<vmem>>, vector<512x256xbf16>
    %cst_8 = arith.constant dense<0.000000e+00> : vector<8x256xf32>
    %12 = tpu.matmul %10, %11, %cst_8 {dimension_numbers = #tpu.dot_dimension_numbers<[1], [0], [0], [1], [0, 0, 1, 1], [], []>} : vector<8x512xbf16>, vector<512x256xbf16>, vector<8x256xf32> -> vector<8x256xf32>
    %c0_9 = arith.constant 0 : index
    %c0_10 = arith.constant 0 : index
    %13 = vector.load %arg5[%c0_9, %c0_10] : memref<1x256xf32, #tpu.memory_space<vmem>>, vector<1x256xf32>
    %14 = vector.broadcast %13 : vector<1x256xf32> to vector<8x256xf32>
    %15 = arith.addf %12, %14 : vector<8x256xf32>
    %cst_11 = arith.constant 2.000000e-01 : f32
    %16 = vector.broadcast %cst_11 : f32 to vector<8x256xf32>
    %17 = arith.mulf %16, %15 : vector<8x256xf32>
    %18 = arith.maximumf %15, %17 : vector<8x256xf32>
    %c0_12 = arith.constant 0 : index
    %c0_13 = arith.constant 0 : index
    %19 = vector.load %arg6[%c0_12, %c0_13] : memref<8x256xbf16, #tpu.memory_space<vmem>>, vector<8x256xbf16>
    %20 = arith.truncf %18 : vector<8x256xf32> to vector<8x256xbf16>
    %cst_14 = arith.constant dense<0.000000e+00> : vector<8x8xf32>
    %21 = tpu.matmul %19, %20, %cst_14 {dimension_numbers = #tpu.dot_dimension_numbers<[1], [1], [0], [0], [0, 0, 1, 0], [], []>} : vector<8x256xbf16>, vector<8x256xbf16>, vector<8x8xf32> -> vector<8x8xf32>
    %22 = vector.extract_strided_slice %21 {offsets = [0, 0], sizes = [1, 8], strides = [1, 1]} : vector<8x8xf32> to vector<1x8xf32>
    %c0_15 = arith.constant 0 : index
    %c0_16 = arith.constant 0 : index
    %23 = memref.load %arg7[%c0_15, %c0_16] : memref<1x1xf32, #tpu.memory_space<smem>>
    %24 = vector.broadcast %23 : f32 to vector<1x8xf32>
    %25 = arith.addf %22, %24 : vector<1x8xf32>
    %26 = arith.negf %25 : vector<1x8xf32>
    %27 = math.exp %26 : vector<1x8xf32>
    %cst_17 = arith.constant 1.000000e+00 : f32
    %28 = vector.broadcast %cst_17 : f32 to vector<1x8xf32>
    %29 = arith.addf %28, %27 : vector<1x8xf32>
    %30 = arith.divf %28, %29 : vector<1x8xf32>
    %c0_18 = arith.constant 0 : index
    %c0_19 = arith.constant 0 : index
    %31 = vector.load %arg8[%c0_18, %c0_19] : memref<1x8xf32, #tpu.memory_space<vmem>>, vector<1x8xf32>
    tpu.vector_store %arg8[%c0_18, %c0_19], %30 {strides = array<i32>} : memref<1x8xf32, #tpu.memory_space<vmem>>, vector<1x8xf32>,
    return
  }
  func.func @transform_0(%arg0: i32) -> (i32, i32) {
    %c0_i32 = arith.constant 0 : i32
    %c0_i32_0 = arith.constant 0 : i32
    return %arg0, %c0_i32 : i32, i32
  }
  func.func @transform_1(%arg0: i32) -> (i32, i32) {
    %c0_i32 = arith.constant 0 : i32
    %c0_i32_0 = arith.constant 0 : i32
    %c0_i32_1 = arith.constant 0 : i32
    return %c0_i32, %c0_i32_0 : i32, i32
  }
  func.func @transform_2(%arg0: i32) -> (i32, i32) {
    %c0_i32 = arith.constant 0 : i32
    %c0_i32_0 = arith.constant 0 : i32
    %c0_i32_1 = arith.constant 0 : i32
    return %c0_i32, %c0_i32_0 : i32, i32
  }
  func.func @transform_3(%arg0: i32) -> (i32, i32) {
    %c0_i32 = arith.constant 0 : i32
    %c0_i32_0 = arith.constant 0 : i32
    %c0_i32_1 = arith.constant 0 : i32
    return %c0_i32, %c0_i32_0 : i32, i32
  }
  func.func @transform_4(%arg0: i32) -> (i32, i32) {
    %c0_i32 = arith.constant 0 : i32
    %c0_i32_0 = arith.constant 0 : i32
    %c0_i32_1 = arith.constant 0 : i32
    return %c0_i32, %c0_i32_0 : i32, i32
  }
  func.func @transform_5(%arg0: i32) -> (i32, i32) {
    %c0_i32 = arith.constant 0 : i32
    %c0_i32_0 = arith.constant 0 : i32
    %c0_i32_1 = arith.constant 0 : i32
    return %c0_i32, %c0_i32_0 : i32, i32
  }
  func.func @transform_6(%arg0: i32) -> (i32, i32) {
    %c0_i32 = arith.constant 0 : i32
    %c0_i32_0 = arith.constant 0 : i32
    %c0_i32_1 = arith.constant 0 : i32
    return %c0_i32, %c0_i32_0 : i32, i32
  }
  func.func @transform_7(%arg0: i32) -> (i32, i32) {
    %c0_i32 = arith.constant 0 : i32
    %c0_i32_0 = arith.constant 0 : i32
    return %arg0, %c0_i32 : i32, i32
  }
}

</mosaic_0001>

<bundles_post_ra>
// kernel: tpu_custom_call.1
= control target key start
LH: loop header
LB: loop body
LE: loop exit
PB: predicated region body
PF: predicated region fallthrough
CT: control target
= control target key end

     0   :  { %13 = vsyncpa [#allocation4], 0  ;;  %s3748_s0 = inlined_call_operand.hbm [shape: f32[2,1024], index: 0, kind: input, shape index: {}]   ;;  %s3749_s1 = inlined_call_operand.hbm [shape: bf16[1024,512], index: 1, kind: input, shape index: {}]   ;;  %s3750_s2 = inlined_call_operand.hbm [shape: f32[1,512], index: 2, kind: input, shape index: {}]   ;;  %s3751_s3 = inlined_call_operand.hbm [shape: bf16[512,256], index: 3, kind: input, shape index: {}]   ;;  %s3752_s4 = inlined_call_operand.vmem [shape: f32[1,256], index: 4, kind: input, shape index: {}]   ;;  %s3753_s5 = inlined_call_operand.vmem [shape: bf16[8,256], index: 5, kind: input, shape index: {}]   ;;  %s3754_s6 = inlined_call_operand.<no memory space> [shape: f32[1,1], index: 6, kind: input, shape index: {}]   ;;  %s3755_s7 = inlined_call_operand.hbm [shape: f32[1,8], index: 7, kind: output, shape index: {}]  }
   0x1   :  { %14 = vsyncpa [#allocation7], 0 }
   0x2   :  { %15 = vsyncpa [#allocation10], 0 }
   0x3   :  { %16 = vsyncpa [#allocation5], 0 }
   0x4   :  { %21 = vsyncadd [#allocation4], 768  ;;  %s3583_s24 = smov [#allocation6]   ;;  %s3584_s26 = smov [#allocation3]  }
   0x5   :  { %s34_s25 = sshll.u32 %s3583_s24, 4  ;;  %s22_s27 = sshll.u32 %s3584_s26, 4  ;;  %s35_s25 = int_to_ptr.vmem [resolvable:$true] %s34_s25  ;;  %s23_s27 = int_to_ptr.vmem [resolvable:$true] %s22_s27 }
   0x6   :  { %s3483_s28 = scalar_lea.vmem %s35_s25, 32768  ;;  %p3488_p1 = scmp.lt.s32.totalorder %s35_s25, %s35_s25 }
   0x7   :  { %p3484_p0 = scmp.ne.s32.totalorder %s35_s25, %s3483_s28  ;;  %p3489_p2 = scmp.lt.s32.totalorder %s3483_s28, %s3483_s28 }
   0x9   :  { %p3490_p3 = por %p3489_p2, %p3488_p1 }
   0xb   :  { %p3491_p4 = pnand %p3490_p3, %p3484_p0 }
   0xd   :  { %3494 = shalt.err (!%p3491_p4)
}
   0xe   :  { %s3585_s29 = smov 256   ;;  %s3586_s30 = smov 16  }
   0xf   :  { %40 = dma.hbm_to_vmem [thread:$0]  %s3749_s1, 32768, %s35_s25, [#allocation7], %s3585_s29, %s3585_s29, %s3586_s30  }
  0x10   :  { %s3503_s10 = scalar_lea.vmem %s23_s27, 256  ;;  %s3507_s11 = scalar_lea.vmem %s23_s27, 1024 }
  0x11   :  { %p3504_p5 = scmp.ne.s32.totalorder %s23_s27, %s3503_s10  ;;  %p3508_p6 = scmp.lt.s32.totalorder %s23_s27, %s23_s27 }
  0x12   :  { %p3509_p7 = scmp.lt.s32.totalorder %s3507_s11, %s3503_s10 }
  0x14   :  { %p3510_p8 = por %p3509_p7, %p3508_p6 }
  0x16   :  { %p3511_p9 = pnand %p3510_p8, %p3504_p5 }
  0x18   :  { %3514 = shalt.err (!%p3511_p9)
}
  0x19   :  { %28 = dma.hbm_to_vmem [thread:$0]  %s3748_s0, 256, %s23_s27, [#allocation4], %s3585_s29, %s3585_s29, %s3586_s30  }
  0x1a   :  { %s3587_s14 = smov [#allocation8]   ;;  %s3588_s16 = smov [#allocation9]  }
  0x1b   :  { %s47_s15 = sshll.u32 %s3587_s14, 4  ;;  %s56_s17 = sshll.u32 %s3588_s16, 4  ;;  %s48_s15 = int_to_ptr.vmem [resolvable:$true] %s47_s15  ;;  %s57_s17 = int_to_ptr.vmem [resolvable:$true] %s56_s17 }
  0x1c   :  { %s3523_s18 = scalar_lea.vmem %s48_s15, 64  ;;  %p3528_p11 = scmp.lt.s32.totalorder %s48_s15, %s48_s15 }
  0x1d   :  { %p3524_p10 = scmp.ne.s32.totalorder %s48_s15, %s3523_s18  ;;  %p3529_p12 = scmp.lt.s32.totalorder %s3523_s18, %s3523_s18 }
  0x1f   :  { %p3530_p13 = por %p3529_p12, %p3528_p11 }
  0x21   :  { %p3531_p0 = pnand %p3530_p13, %p3524_p10 }
  0x23   :  { %3534 = shalt.err (!%p3531_p0)
}
  0x24   :  { %50 = dma.hbm_to_vmem [thread:$0]  %s3750_s2, 64, %s48_s15, [#allocation7]  }
  0x25   :  { %s3543_s20 = scalar_lea.vmem %s57_s17, 8192  ;;  %p3548_p2 = scmp.lt.s32.totalorder %s57_s17, %s57_s17 }
  0x26   :  { %p3544_p1 = scmp.ne.s32.totalorder %s57_s17, %s3543_s20  ;;  %p3549_p3 = scmp.lt.s32.totalorder %s3543_s20, %s3543_s20 }
  0x28   :  { %p3550_p4 = por %p3549_p3, %p3548_p2 }
  0x2a   :  { %p3551_p5 = pnand %p3550_p4, %p3544_p1 }
  0x2c   :  { %3554 = shalt.err (!%p3551_p5)
}
  0x2d   :  { %s3589_s0 = smov 128   ;;  %s3590_s21 = smov 8  }
  0x2e   :  { %62 = dma.hbm_to_vmem [thread:$0]  %s3751_s3, 8192, %s57_s17, [#allocation10], %s3589_s0, %s3589_s0, %s3590_s21  }
  0x2f   :  { %3575 = dma.done.wait [#allocation4], 1024  }
  0x30   :  { %3576 = vsyncadd [#allocation4], 4294966272 }
  0x31   :  { %3577 = dma.done.wait [#allocation7], 32832  }
  0x32   :  { %3578 = vsyncadd [#allocation7], 4294934464 }
  0x33   :  { %3579 = dma.done.wait [#allocation10], 8192  }
  0x34   :  { %3580 = vsyncadd [#allocation10], 4294959104  ;;  %v2977_v0 = vld [vmem:[#allocation6 + $0xe4] ss:$16 sps:$4 sm:$0xff]   ;;  %v2981_v2 = vld [vmem:[#allocation6 + $0xe0] ss:$16 sps:$4 sm:$0xff]   ;;  %v105_v40 = vlaneseq }
  0x35   :  { %v2979_v1 = vld [vmem:[#allocation6 + $0x2e4] ss:$16 sps:$4 sm:$0xff]   ;;  %1744 = vmatprep.subr.bf16.mxu0 %v2977_v0  ;;  %v2982_v3 = vld [vmem:[#allocation6 + $0x2e0] ss:$16 sps:$4 sm:$0xff]   ;;  %v3591_v38 = vmov 1983009808  }
  0x36   :  { %1785 = vmatprep.subr.bf16.mxu1 %v2979_v1  ;;  %v2983_v4 = vld [vmem:[#allocation6 + $0xc4] ss:$16 sps:$4 sm:$0xff]   ;;  %1745 = vmatpush1.bf16.msra.mxu0 %v2981_v2  ;;  %v2987_v6 = vld [vmem:[#allocation6 + $0xc0] ss:$16 sps:$4 sm:$0xff]   ;;  %v103_v39 = vunpack.c.l.s4 %v3591_v38  ;;  %v3645_v46 = vshrl.u32 %v105_v40, 7  ;;  %s3592_s26 = smov [#allocation11]  }
  0x37   :  { %1786 = vmatpush1.bf16.msra.mxu1 %v2982_v3  ;;  %v2985_v5 = vld [vmem:[#allocation6 + $0x2c4] ss:$16 sps:$4 sm:$0xff]   ;;  %1746 = vmatprep.subr.bf16.mxu0 %v2983_v4  ;;  %v2988_v7 = vld [vmem:[#allocation6 + $0x2c0] ss:$16 sps:$4 sm:$0xff]   ;;  %s2633_s27 = sshll.u32 %s3592_s26, 4  ;;  %vm2625_vm0 = vcmask 57344   ;;  %s2634_s27 = int_to_ptr.vmem [resolvable:$true] %s2633_s27 }
  0x38   :  { %1787 = vmatprep.subr.bf16.mxu1 %v2985_v5  ;;  %v2989_v8 = vld [vmem:[#allocation6 + $0xa4] ss:$16 sps:$4 sm:$0xff]   ;;  %v2993_v10 = vld [vmem:[#allocation6 + $0xa0] ss:$16 sps:$4 sm:$0xff]   ;;  %v104_v45 = vunpack.c.0.s8 %v103_v39  ;;  %s3555_s28 = scalar_lea.vmem %s2634_s27, 16  ;;  %s3559_s29 = scalar_lea.vmem %s2634_s27, 32 }
  0x39   :  { %v2991_v9 = vld [vmem:[#allocation6 + $0x2a4] ss:$16 sps:$4 sm:$0xff]   ;;  %v2994_v11 = vld [vmem:[#allocation6 + $0x2a0] ss:$16 sps:$4 sm:$0xff]   ;;  %p3556_p6 = scmp.ne.s32.totalorder %s2634_s27, %s3555_s28  ;;  %p3560_p7 = scmp.lt.s32.totalorder %s2634_s27, %s2634_s27 }
  0x3a   :  { %1747 = vmatpush1.bf16.msra.mxu0 %v2987_v6  ;;  %v2995_v12 = vld [vmem:[#allocation6 + $0x84] ss:$16 sps:$4 sm:$0xff]   ;;  %v2999_v14 = vld [vmem:[#allocation6 + $0x80] ss:$16 sps:$4 sm:$0xff]   ;;  %v3648_v53 = vsub.s32 %v104_v45, %v3645_v46  ;;  %p3561_p8 = scmp.lt.s32.totalorder %s3559_s29, %s3555_s28 }
  0x3b   :  { %1788 = vmatpush1.bf16.msra.mxu1 %v2988_v7  ;;  %1748 = vmatprep.subr.bf16.mxu0 %v2989_v8  ;;  %v2997_v13 = vld [vmem:[#allocation6 + $0x284] ss:$16 sps:$4 sm:$0xff]   ;;  %v3000_v15 = vld [vmem:[#allocation6 + $0x280] ss:$16 sps:$4 sm:$0xff]  }
  0x3c   :  { %1789 = vmatprep.subr.bf16.mxu1 %v2991_v9  ;;  %v3001_v16 = vld [vmem:[#allocation6 + $0x64] ss:$16 sps:$4 sm:$0xff]   ;;  %v3005_v18 = vld [vmem:[#allocation6 + $0x60] ss:$16 sps:$4 sm:$0xff]   ;;  %p3562_p9 = por %p3561_p8, %p3560_p7 }
  0x3d   :  { %v3003_v17 = vld [vmem:[#allocation6 + $0x264] ss:$16 sps:$4 sm:$0xff]   ;;  %v3006_v19 = vld [vmem:[#allocation6 + $0x260] ss:$16 sps:$4 sm:$0xff]  }
  0x3e   :  { %1749 = vmatpush1.bf16.msra.mxu0 %v2993_v10  ;;  %v3007_v20 = vld [vmem:[#allocation6 + $0x44] ss:$16 sps:$4 sm:$0xff]   ;;  %v3011_v22 = vld [vmem:[#allocation6 + $0x40] ss:$16 sps:$4 sm:$0xff]   ;;  %p3563_p10 = pnand %p3562_p9, %p3556_p6 }
  0x3f   :  { %1790 = vmatpush1.bf16.msra.mxu1 %v2994_v11  ;;  %1750 = vmatprep.subr.bf16.mxu0 %v2995_v12  ;;  %v3009_v21 = vld [vmem:[#allocation6 + $0x244] ss:$16 sps:$4 sm:$0xff]   ;;  %v3012_v23 = vld [vmem:[#allocation6 + $0x240] ss:$16 sps:$4 sm:$0xff]  }
  0x40   :  { %1791 = vmatprep.subr.bf16.mxu1 %v2997_v13  ;;  %v3013_v24 = vld [vmem:[#allocation6 + $0x24] ss:$16 sps:$4 sm:$0xff]   ;;  %v3017_v26 = vld [vmem:[#allocation6 + $0x20] ss:$16 sps:$4 sm:$0xff]  }
  0x41   :  { %v3015_v25 = vld [vmem:[#allocation6 + $0x224] ss:$16 sps:$4 sm:$0xff]   ;;  %v3018_v27 = vld [vmem:[#allocation6 + $0x220] ss:$16 sps:$4 sm:$0xff]  }
  0x42   :  { %1751 = vmatpush1.bf16.msra.mxu0 %v2999_v14  ;;  %v3019_v28 = vld [vmem:[#allocation6 + $0x4] ss:$16 sps:$4 sm:$0xff]   ;;  %v3023_v30 = vld [vmem:[#allocation6] ss:$16 sps:$4 sm:$0xff]  }
  0x43   :  { %1792 = vmatpush1.bf16.msra.mxu1 %v3000_v15  ;;  %1752 = vmatprep.subr.bf16.mxu0 %v3001_v16  ;;  %v3021_v29 = vld [vmem:[#allocation6 + $0x204] ss:$16 sps:$4 sm:$0xff]   ;;  %v3024_v31 = vld [vmem:[#allocation6 + $0x200] ss:$16 sps:$4 sm:$0xff]  }
  0x44   :  { %1793 = vmatprep.subr.bf16.mxu1 %v3003_v17  ;;  %v3025_v32 = vld [vmem:[#allocation6 + $0x1e4] ss:$16 sps:$4 sm:$0xff]   ;;  %v3029_v34 = vld [vmem:[#allocation6 + $0x1e0] ss:$16 sps:$4 sm:$0xff]  }
  0x45   :  { %v3027_v33 = vld [vmem:[#allocation6 + $0x3e4] ss:$16 sps:$4 sm:$0xff]   ;;  %v3030_v35 = vld [vmem:[#allocation6 + $0x3e0] ss:$16 sps:$4 sm:$0xff]  }
  0x46   :  { %1753 = vmatpush1.bf16.msra.mxu0 %v3005_v18  ;;  %v3031_v36 = vld [vmem:[#allocation6 + $0x1c4] ss:$16 sps:$4 sm:$0xff]   ;;  %v3035_v41 = vld [vmem:[#allocation6 + $0x1c0] ss:$16 sps:$4 sm:$0xff]  }
  0x47   :  { %1794 = vmatpush1.bf16.msra.mxu1 %v3006_v19  ;;  %1754 = vmatprep.subr.bf16.mxu0 %v3007_v20  ;;  %v3033_v37 = vld [vmem:[#allocation6 + $0x3c4] ss:$16 sps:$4 sm:$0xff]   ;;  %v3036_v42 = vld [vmem:[#allocation6 + $0x3c0] ss:$16 sps:$4 sm:$0xff]  }
  0x48   :  { %1795 = vmatprep.subr.bf16.mxu1 %v3009_v21  ;;  %v3037_v43 = vld [vmem:[#allocation6 + $0x1a4] ss:$16 sps:$4 sm:$0xff]   ;;  %v3041_v47 = vld [vmem:[#allocation6 + $0x1a0] ss:$16 sps:$4 sm:$0xff]  }
  0x49   :  { %v3039_v44 = vld [vmem:[#allocation6 + $0x3a4] ss:$16 sps:$4 sm:$0xff]   ;;  %v3042_v48 = vld [vmem:[#allocation6 + $0x3a0] ss:$16 sps:$4 sm:$0xff]  }
  0x4a   :  { %1755 = vmatpush1.bf16.msra.mxu0 %v3011_v22  ;;  %v3043_v49 = vld [vmem:[#allocation6 + $0x184] ss:$16 sps:$4 sm:$0xff]   ;;  %v3047_v51 = vld [vmem:[#allocation6 + $0x180] ss:$16 sps:$4 sm:$0xff]  }
  0x4b   :  { %1796 = vmatpush1.bf16.msra.mxu1 %v3012_v23  ;;  %1756 = vmatprep.subr.bf16.mxu0 %v3013_v24  ;;  %v3045_v50 = vld [vmem:[#allocation6 + $0x384] ss:$16 sps:$4 sm:$0xff]   ;;  %v3048_v52 = vld [vmem:[#allocation6 + $0x380] ss:$16 sps:$4 sm:$0xff]  }
  0x4c   :  { %1797 = vmatprep.subr.bf16.mxu1 %v3015_v25  ;;  %v3049_v54 = vld [vmem:[#allocation6 + $0x164] ss:$16 sps:$4 sm:$0xff]   ;;  %v3073_v56 = vld [vmem:[#allocation3] ss:$16 sps:$4 sm:$0xff]  }
  0x4d   :  { %v3051_v55 = vld [vmem:[#allocation6 + $0x364] ss:$16 sps:$4 sm:$0xff]   ;;  %v3075_v57 = vld [vmem:[#allocation3 + $0x20] ss:$16 sps:$4 sm:$0xff]   ;;  %v108_v60 = vrot.slane %v3073_v56, %v3648_v53  ;;  %v3179_v56 = vld [vmem:[#allocation3 + $0xc] ss:$16 sps:$4 sm:$0xff]  }
  0x4e   :  { %1757 = vmatpush1.bf16.msra.mxu0 %v3017_v26  ;;  %v3077_v58 = vld [vmem:[#allocation3 + $0x4] ss:$16 sps:$4 sm:$0xff]   ;;  %v122_v61 = vrot.slane %v3075_v57, %v3648_v53  ;;  %v3053_v63 = vld [vmem:[#allocation6 + $0x160] ss:$16 sps:$4 sm:$0xff]   ;;  %v3180_v57 = vld [vmem:[#allocation3 + $0x2c] ss:$16 sps:$4 sm:$0xff]  }
  0x4f   :  { %1798 = vmatpush1.bf16.msra.mxu1 %v3018_v27  ;;  %1758 = vmatprep.subr.bf16.mxu0 %v3019_v28  ;;  %v3078_v59 = vld [vmem:[#allocation3 + $0x24] ss:$16 sps:$4 sm:$0xff]   ;;  %v115_v62 = vrot.slane %v3077_v58, %v3648_v53  ;;  %v3054_v0 = vld [vmem:[#allocation6 + $0x360] ss:$16 sps:$4 sm:$0xff]  }
  0x50   :  { %1799 = vmatprep.subr.bf16.mxu1 %v3021_v29  ;;  %v129_v1 = vrot.slane %v3078_v59, %v3648_v53  ;;  %v3055_v2 = vld [vmem:[#allocation6 + $0x144] ss:$16 sps:$4 sm:$0xff]   ;;  %v131_v3 = vcombine.high %v108_v60, %v122_v61  ;;  %v3059_v7 = vld [vmem:[#allocation6 + $0x140] ss:$16 sps:$4 sm:$0xff]   ;;  %v130_v18 = vcombine.low %v108_v60, %v122_v61 }
  0x51   :  { %v3057_v4 = vld [vmem:[#allocation6 + $0x344] ss:$16 sps:$4 sm:$0xff]   ;;  %v3060_v8 = vld [vmem:[#allocation6 + $0x340] ss:$16 sps:$4 sm:$0xff]  }
  0x52   :  { %1759 = vmatpush1.bf16.msra.mxu0 %v3023_v30  ;;  %v133_v5 = vcombine.high %v115_v62, %v129_v1  ;;  %v3654_v6 = vpack.c.bf16 %v131_v3, %v131_v3  ;;  %v3061_v10 = vld [vmem:[#allocation6 + $0x124] ss:$16 sps:$4 sm:$0xff]   ;;  %v3065_v12 = vld [vmem:[#allocation6 + $0x120] ss:$16 sps:$4 sm:$0xff]   ;;  %v132_v19 = vcombine.low %v115_v62, %v129_v1  ;;  %v3660_v22 = vpack.c.bf16 %v130_v18, %v130_v18 }
  0x53   :  { %1800 = vmatpush1.bf16.msra.mxu1 %v3024_v31  ;;  %1760 = vmatprep.subr.bf16.mxu0 %v3025_v32  ;;  %v3063_v11 = vld [vmem:[#allocation6 + $0x324] ss:$16 sps:$4 sm:$0xff]   ;;  %v3066_v13 = vld [vmem:[#allocation6 + $0x320] ss:$16 sps:$4 sm:$0xff]  }
  0x54   :  { %1801 = vmatprep.subr.bf16.mxu1 %v3027_v33  ;;  %v3656_v9 = vpack.c.bf16 %v133_v5, %v133_v5  ;;  %1776 = vmatprep.mubr.bf16.mxu0 %v3654_v6  ;;  %v3067_v14 = vld [vmem:[#allocation6 + $0x104] ss:$16 sps:$4 sm:$0xff]   ;;  %v3071_v16 = vld [vmem:[#allocation6 + $0x100] ss:$16 sps:$4 sm:$0xff]   ;;  %v3662_v23 = vpack.c.bf16 %v132_v19, %v132_v19 }
  0x55   :  { %v3069_v15 = vld [vmem:[#allocation6 + $0x304] ss:$16 sps:$4 sm:$0xff]   ;;  %v3072_v17 = vld [vmem:[#allocation6 + $0x300] ss:$16 sps:$4 sm:$0xff]  }
  0x56   :  { %1761 = vmatpush2.bf16.msra.mxu0 %v3029_v34  ;;  %1817 = vmatprep.mubr.bf16.mxu1 %v3656_v9  ;;  %v3081_v20 = vld [vmem:[#allocation6 + $0x4e4] ss:$16 sps:$4 sm:$0xff]   ;;  %v3079_v24 = vld [vmem:[#allocation6 + $0x4e0] ss:$16 sps:$4 sm:$0xff]  }
  0x57   :  { %1802 = vmatpush2.bf16.msra.mxu1 %v3030_v35  ;;  %1762 = vmatprep.subr.bf16.mxu0 %v3031_v36  ;;  %v3084_v21 = vld [vmem:[#allocation6 + $0x6e4] ss:$16 sps:$4 sm:$0xff]   ;;  %v3082_v25 = vld [vmem:[#allocation6 + $0x6e0] ss:$16 sps:$4 sm:$0xff]  }
  0x58   :  { %1803 = vmatprep.subr.bf16.mxu1 %v3033_v37  ;;  %v3087_v26 = vld [vmem:[#allocation6 + $0x4c4] ss:$16 sps:$4 sm:$0xff]   ;;  %v3085_v28 = vld [vmem:[#allocation6 + $0x4c0] ss:$16 sps:$4 sm:$0xff]  }
  0x59   :  { %v3090_v27 = vld [vmem:[#allocation6 + $0x6c4] ss:$16 sps:$4 sm:$0xff]   ;;  %v3088_v29 = vld [vmem:[#allocation6 + $0x6c0] ss:$16 sps:$4 sm:$0xff]  }
  0x5a   :  { %1763 = vmatpush2.bf16.msra.mxu0 %v3035_v41  ;;  %v3093_v30 = vld [vmem:[#allocation6 + $0x4a4] ss:$16 sps:$4 sm:$0xff]   ;;  %v3091_v32 = vld [vmem:[#allocation6 + $0x4a0] ss:$16 sps:$4 sm:$0xff]  }
  0x5b   :  { %1804 = vmatpush2.bf16.msra.mxu1 %v3036_v42  ;;  %1764 = vmatprep.subr.bf16.mxu0 %v3037_v43  ;;  %v3096_v31 = vld [vmem:[#allocation6 + $0x6a4] ss:$16 sps:$4 sm:$0xff]   ;;  %v3094_v33 = vld [vmem:[#allocation6 + $0x6a0] ss:$16 sps:$4 sm:$0xff]  }
  0x5c   :  { %1805 = vmatprep.subr.bf16.mxu1 %v3039_v44  ;;  %v3099_v34 = vld [vmem:[#allocation6 + $0x484] ss:$16 sps:$4 sm:$0xff]   ;;  %v3097_v36 = vld [vmem:[#allocation6 + $0x480] ss:$16 sps:$4 sm:$0xff]  }
  0x5d   :  { %v3102_v35 = vld [vmem:[#allocation6 + $0x684] ss:$16 sps:$4 sm:$0xff]   ;;  %v3100_v37 = vld [vmem:[#allocation6 + $0x680] ss:$16 sps:$4 sm:$0xff]  }
  0x5e   :  { %1765 = vmatpush2.bf16.msra.mxu0 %v3041_v47  ;;  %v3105_v38 = vld [vmem:[#allocation6 + $0x464] ss:$16 sps:$4 sm:$0xff]   ;;  %v3103_v40 = vld [vmem:[#allocation6 + $0x460] ss:$16 sps:$4 sm:$0xff]  }
  0x5f   :  { %1806 = vmatpush2.bf16.msra.mxu1 %v3042_v48  ;;  %1766 = vmatprep.subr.bf16.mxu0 %v3043_v49  ;;  %v3108_v39 = vld [vmem:[#allocation6 + $0x664] ss:$16 sps:$4 sm:$0xff]   ;;  %v3106_v41 = vld [vmem:[#allocation6 + $0x660] ss:$16 sps:$4 sm:$0xff]  }
  0x60   :  { %1807 = vmatprep.subr.bf16.mxu1 %v3045_v50  ;;  %v3111_v42 = vld [vmem:[#allocation6 + $0x444] ss:$16 sps:$4 sm:$0xff]   ;;  %v3109_v44 = vld [vmem:[#allocation6 + $0x440] ss:$16 sps:$4 sm:$0xff]  }
  0x61   :  { %v3114_v43 = vld [vmem:[#allocation6 + $0x644] ss:$16 sps:$4 sm:$0xff]   ;;  %v3112_v45 = vld [vmem:[#allocation6 + $0x640] ss:$16 sps:$4 sm:$0xff]  }
  0x62   :  { %1767 = vmatpush2.bf16.msra.mxu0 %v3047_v51  ;;  %v3117_v47 = vld [vmem:[#allocation6 + $0x424] ss:$16 sps:$4 sm:$0xff]   ;;  %v3115_v49 = vld [vmem:[#allocation6 + $0x420] ss:$16 sps:$4 sm:$0xff]  }
  0x63   :  { %1808 = vmatpush2.bf16.msra.mxu1 %v3048_v52  ;;  %1768 = vmatprep.subr.bf16.mxu0 %v3049_v54  ;;  %v3120_v48 = vld [vmem:[#allocation6 + $0x624] ss:$16 sps:$4 sm:$0xff]   ;;  %v3118_v50 = vld [vmem:[#allocation6 + $0x620] ss:$16 sps:$4 sm:$0xff]   ;;  %v3175_v54 = vld [vmem:[#allocation3 + $0x8] ss:$16 sps:$4 sm:$0xff]  }
  0x64   :  { %1809 = vmatprep.subr.bf16.mxu1 %v3051_v55  ;;  %v3123_v51 = vld [vmem:[#allocation6 + $0x404] ss:$16 sps:$4 sm:$0xff]   ;;  %v3177_v55 = vld [vmem:[#allocation3 + $0x28] ss:$16 sps:$4 sm:$0xff]   ;;  %v3121_v58 = vld [vmem:[#allocation6 + $0x400] ss:$16 sps:$4 sm:$0xff]   ;;  %v3667_v60 = vrot.slane %v3175_v54, %v3648_v53 }
  0x65   :  { %v3126_v52 = vld [vmem:[#allocation6 + $0x604] ss:$16 sps:$4 sm:$0xff]   ;;  %v3124_v59 = vld [vmem:[#allocation6 + $0x600] ss:$16 sps:$4 sm:$0xff]   ;;  %v3670_v61 = vrot.slane %v3177_v55, %v3648_v53  ;;  %v3198_v54 = vld [vmem:[#allocation6 + $0x2ac] ss:$16 sps:$4 sm:$0xff]  }
  0x66   :  { %1769 = vmatpush2.bf16.msra.mxu0 %v3053_v63  ;;  %v3129_v62 = vld [vmem:[#allocation6 + $0x5e4] ss:$16 sps:$4 sm:$0xff]   ;;  %v3673_v63 = vrot.slane %v3179_v56, %v3648_v53  ;;  %v3130_v5 = vld [vmem:[#allocation6 + $0x7e0] ss:$16 sps:$4 sm:$0xff]   ;;  %v3193_v55 = vld [vmem:[#allocation6 + $0xa8] ss:$16 sps:$4 sm:$0xff]  }
  0x67   :  { %1810 = vmatpush2.bf16.msra.mxu1 %v3054_v0  ;;  %1770 = vmatprep.subr.bf16.mxu0 %v3055_v2  ;;  %v3676_v0 = vrot.slane %v3180_v57, %v3648_v53  ;;  %v3132_v1 = vld [vmem:[#allocation6 + $0x7e4] ss:$16 sps:$4 sm:$0xff]   ;;  %v167_v2 = vcombine.high %v3667_v60, %v3670_v61  ;;  %v3145_v19 = vld [vmem:[#allocation6 + $0x580] ss:$16 sps:$4 sm:$0xff]   ;;  %v3196_v56 = vld [vmem:[#allocation6 + $0x2a8] ss:$16 sps:$4 sm:$0xff]  }
  0x68   :  { %1811 = vmatprep.subr.bf16.mxu1 %v3057_v4  ;;  %v3127_v4 = vld [vmem:[#allocation6 + $0x5e0] ss:$16 sps:$4 sm:$0xff]   ;;  %v3138_v53 = vld [vmem:[#allocation6 + $0x7c4] ss:$16 sps:$4 sm:$0xff]   ;;  %v3201_v57 = vld [vmem:[#allocation6 + $0x8c] ss:$16 sps:$4 sm:$0xff]  }
  0x69   :  { %v169_v3 = vcombine.high %v3673_v63, %v3676_v0  ;;  %v3150_v18 = vld [vmem:[#allocation6 + $0x784] ss:$16 sps:$4 sm:$0xff]  }
  0x6a   :  { %1771 = vmatpush2.bf16.msra.mxu0 %v3059_v7  ;;  %v3682_v7 = vpack.c.bf16 %v167_v2, %v167_v2  ;;  %v3214_v2 = vld [vmem:[#allocation6 + $0x248] ss:$16 sps:$4 sm:$0xff]  }
  0x6b   :  { %1812 = vmatpush2.bf16.msra.mxu1 %v3060_v8  ;;  %1772 = vmatprep.subr.bf16.mxu0 %v3061_v10  ;;  %v3135_v8 = vld [vmem:[#allocation6 + $0x5c4] ss:$16 sps:$4 sm:$0xff]   ;;  %v3684_v10 = vpack.c.bf16 %v169_v3, %v169_v3  ;;  %v3219_v3 = vld [vmem:[#allocation6 + $0x2c] ss:$16 sps:$4 sm:$0xff]  }
  0x6c   :  { %1813 = vmatprep.subr.bf16.mxu1 %v3063_v11  ;;  %v3133_v11 = vld [vmem:[#allocation6 + $0x5c0] ss:$16 sps:$4 sm:$0xff]  }
  0x6e   :  { %1773 = vmatpush2.bf16.msra.mxu0 %v3065_v12  ;;  %v3136_v12 = vld [vmem:[#allocation6 + $0x7c0] ss:$16 sps:$4 sm:$0xff]  }
  0x6f   :  { %1814 = vmatpush2.bf16.msra.mxu1 %v3066_v13  ;;  %1774 = vmatprep.subr.bf16.mxu0 %v3067_v14  ;;  %v3141_v13 = vld [vmem:[#allocation6 + $0x5a4] ss:$16 sps:$4 sm:$0xff]  }
  0x70   :  { %1815 = vmatprep.subr.bf16.mxu1 %v3069_v15  ;;  %v3144_v14 = vld [vmem:[#allocation6 + $0x7a4] ss:$16 sps:$4 sm:$0xff]   ;;  %v3139_v15 = vld [vmem:[#allocation6 + $0x5a0] ss:$16 sps:$4 sm:$0xff]  }
  0x72   :  { %1775 = vmatpush2.bf16.msra.mxu0 %v3071_v16  ;;  %v3142_v16 = vld [vmem:[#allocation6 + $0x7a0] ss:$16 sps:$4 sm:$0xff]  }
  0x73   :  { %1816 = vmatpush2.bf16.msra.mxu1 %v3072_v17  ;;  %1826 = vmatprep.subr.bf16.mxu0 %v3081_v20  ;;  %v3147_v17 = vld [vmem:[#allocation6 + $0x584] ss:$16 sps:$4 sm:$0xff]   ;;  %v3148_v20 = vld [vmem:[#allocation6 + $0x780] ss:$16 sps:$4 sm:$0xff]  }
  0x74   :  { %1867 = vmatprep.subr.bf16.mxu1 %v3084_v21  ;;  %v3153_v21 = vld [vmem:[#allocation6 + $0x564] ss:$16 sps:$4 sm:$0xff]  }
  0x75   :  { %1777 = vmatmul.mubr.bf16.vlgmr.msra.gmra.mxu0 %v3660_v22 }
  0x76   :  { %1818 = vmatmul.mubr.bf16.vlgmr.msra.gmra.mxu1 %v3662_v23  ;;  %1827 = vmatpush1.bf16.msra.mxu0 %v3079_v24  ;;  %v3156_v24 = vld [vmem:[#allocation6 + $0x764] ss:$16 sps:$4 sm:$0xff]  }
  0x77   :  { %1868 = vmatpush1.bf16.msra.mxu1 %v3082_v25  ;;  %1828 = vmatprep.subr.bf16.mxu0 %v3087_v26  ;;  %v3151_v25 = vld [vmem:[#allocation6 + $0x560] ss:$16 sps:$4 sm:$0xff]  }
  0x78   :  { %1869 = vmatprep.subr.bf16.mxu1 %v3090_v27  ;;  %1858 = vmatprep.mubr.bf16.mxu0 %v3682_v7  ;;  %v3154_v26 = vld [vmem:[#allocation6 + $0x760] ss:$16 sps:$4 sm:$0xff]   ;;  %v3159_v27 = vld [vmem:[#allocation6 + $0x544] ss:$16 sps:$4 sm:$0xff]  }
  0x79   :  { %1899 = vmatprep.mubr.bf16.mxu1 %v3684_v10 }
  0x7a   :  { %1829 = vmatpush1.bf16.msra.mxu0 %v3085_v28  ;;  %v3162_v28 = vld [vmem:[#allocation6 + $0x744] ss:$16 sps:$4 sm:$0xff]  }
  0x7b   :  { %1870 = vmatpush1.bf16.msra.mxu1 %v3088_v29  ;;  %1830 = vmatprep.subr.bf16.mxu0 %v3093_v30  ;;  %v3157_v29 = vld [vmem:[#allocation6 + $0x540] ss:$16 sps:$4 sm:$0xff]  }
  0x7c   :  { %1871 = vmatprep.subr.bf16.mxu1 %v3096_v31  ;;  %v3160_v30 = vld [vmem:[#allocation6 + $0x740] ss:$16 sps:$4 sm:$0xff]   ;;  %v3165_v31 = vld [vmem:[#allocation6 + $0x524] ss:$16 sps:$4 sm:$0xff]  }
  0x7e   :  { %1831 = vmatpush1.bf16.msra.mxu0 %v3091_v32  ;;  %v3168_v32 = vld [vmem:[#allocation6 + $0x724] ss:$16 sps:$4 sm:$0xff]  }
  0x7f   :  { %1872 = vmatpush1.bf16.msra.mxu1 %v3094_v33  ;;  %1832 = vmatprep.subr.bf16.mxu0 %v3099_v34  ;;  %v3163_v33 = vld [vmem:[#allocation6 + $0x520] ss:$16 sps:$4 sm:$0xff]  }
  0x80   :  { %1873 = vmatprep.subr.bf16.mxu1 %v3102_v35  ;;  %v3166_v34 = vld [vmem:[#allocation6 + $0x720] ss:$16 sps:$4 sm:$0xff]   ;;  %v3171_v35 = vld [vmem:[#allocation6 + $0x504] ss:$16 sps:$4 sm:$0xff]  }
  0x82   :  { %1833 = vmatpush1.bf16.msra.mxu0 %v3097_v36  ;;  %v3174_v36 = vld [vmem:[#allocation6 + $0x704] ss:$16 sps:$4 sm:$0xff]  }
  0x83   :  { %1874 = vmatpush1.bf16.msra.mxu1 %v3100_v37  ;;  %1834 = vmatprep.subr.bf16.mxu0 %v3105_v38  ;;  %v3169_v37 = vld [vmem:[#allocation6 + $0x500] ss:$16 sps:$4 sm:$0xff]  }
  0x84   :  { %1875 = vmatprep.subr.bf16.mxu1 %v3108_v39  ;;  %v3172_v38 = vld [vmem:[#allocation6 + $0x700] ss:$16 sps:$4 sm:$0xff]   ;;  %v166_v39 = vcombine.low %v3667_v60, %v3670_v61  ;;  %v3202_v60 = vld [vmem:[#allocation6 + $0x288] ss:$16 sps:$4 sm:$0xff]   ;;  %v3207_v61 = vld [vmem:[#allocation6 + $0x6c] ss:$16 sps:$4 sm:$0xff]  }
  0x86   :  { %1835 = vmatpush1.bf16.msra.mxu0 %v3103_v40  ;;  %v168_v40 = vcombine.low %v3673_v63, %v3676_v0  ;;  %v3205_v63 = vld [vmem:[#allocation6 + $0x68] ss:$16 sps:$4 sm:$0xff]   ;;  %v3216_v0 = vld [vmem:[#allocation6 + $0x24c] ss:$16 sps:$4 sm:$0xff]  }
  0x87   :  { %1876 = vmatpush1.bf16.msra.mxu1 %v3106_v41  ;;  %1836 = vmatprep.subr.bf16.mxu0 %v3111_v42  ;;  %v3183_v41 = vld [vmem:[#allocation6 + $0xec] ss:$16 sps:$4 sm:$0xff]  }
  0x88   :  { %1877 = vmatprep.subr.bf16.mxu1 %v3114_v43  ;;  %v3186_v42 = vld [vmem:[#allocation6 + $0x2ec] ss:$16 sps:$4 sm:$0xff]   ;;  %v3692_v43 = vpack.c.bf16 %v166_v39, %v166_v39  ;;  %v3262_v39 = vld [vmem:[#allocation6 + $0x348] ss:$16 sps:$4 sm:$0xff]  }
  0x8a   :  { %1837 = vmatpush1.bf16.msra.mxu0 %v3109_v44  ;;  %v3694_v44 = vpack.c.bf16 %v168_v40, %v168_v40  ;;  %v3267_v40 = vld [vmem:[#allocation6 + $0x12c] ss:$16 sps:$4 sm:$0xff]  }
  0x8b   :  { %1878 = vmatpush1.bf16.msra.mxu1 %v3112_v45  ;;  %1838 = vmatprep.subr.bf16.mxu0 %v3117_v47  ;;  %v3181_v45 = vld [vmem:[#allocation6 + $0xe8] ss:$16 sps:$4 sm:$0xff]  }
  0x8c   :  { %1879 = vmatprep.subr.bf16.mxu1 %v3120_v48  ;;  %v3184_v47 = vld [vmem:[#allocation6 + $0x2e8] ss:$16 sps:$4 sm:$0xff]   ;;  %v3189_v48 = vld [vmem:[#allocation6 + $0xcc] ss:$16 sps:$4 sm:$0xff]  }
  0x8e   :  { %1839 = vmatpush1.bf16.msra.mxu0 %v3115_v49  ;;  %v3192_v49 = vld [vmem:[#allocation6 + $0x2cc] ss:$16 sps:$4 sm:$0xff]  }
  0x8f   :  { %1880 = vmatpush1.bf16.msra.mxu1 %v3118_v50  ;;  %1840 = vmatprep.subr.bf16.mxu0 %v3123_v51  ;;  %v3187_v50 = vld [vmem:[#allocation6 + $0xc8] ss:$16 sps:$4 sm:$0xff]  }
  0x90   :  { %1881 = vmatprep.subr.bf16.mxu1 %v3126_v52  ;;  %v3190_v51 = vld [vmem:[#allocation6 + $0x2c8] ss:$16 sps:$4 sm:$0xff]   ;;  %v3195_v52 = vld [vmem:[#allocation6 + $0xac] ss:$16 sps:$4 sm:$0xff]  }
  0x92   :  { %1841 = vmatpush1.bf16.msra.mxu0 %v3121_v58  ;;  %v3204_v58 = vld [vmem:[#allocation6 + $0x28c] ss:$16 sps:$4 sm:$0xff]  }
  0x93   :  { %1882 = vmatpush1.bf16.msra.mxu1 %v3124_v59  ;;  %1842 = vmatprep.subr.bf16.mxu0 %v3129_v62  ;;  %v3199_v59 = vld [vmem:[#allocation6 + $0x88] ss:$16 sps:$4 sm:$0xff]   ;;  %v3210_v62 = vld [vmem:[#allocation6 + $0x26c] ss:$16 sps:$4 sm:$0xff]  }
  0x94   :  { %1883 = vmatprep.subr.bf16.mxu1 %v3132_v1  ;;  %v3211_v1 = vld [vmem:[#allocation6 + $0x48] ss:$16 sps:$4 sm:$0xff]  }
  0x96   :  { %1843 = vmatpush2.bf16.msra.mxu0 %v3127_v4  ;;  %v3222_v4 = vld [vmem:[#allocation6 + $0x22c] ss:$16 sps:$4 sm:$0xff]  }
  0x97   :  { %1884 = vmatpush2.bf16.msra.mxu1 %v3130_v5  ;;  %1844 = vmatprep.subr.bf16.mxu0 %v3135_v8  ;;  %v3217_v5 = vld [vmem:[#allocation6 + $0x28] ss:$16 sps:$4 sm:$0xff]  }
  0x98   :  { %1885 = vmatprep.subr.bf16.mxu1 %v3138_v53  ;;  %v3220_v8 = vld [vmem:[#allocation6 + $0x228] ss:$16 sps:$4 sm:$0xff]   ;;  %v3225_v53 = vld [vmem:[#allocation6 + $0xc] ss:$16 sps:$4 sm:$0xff]  }
  0x9a   :  { %1845 = vmatpush2.bf16.msra.mxu0 %v3133_v11  ;;  %v3228_v11 = vld [vmem:[#allocation6 + $0x20c] ss:$16 sps:$4 sm:$0xff]  }
  0x9b   :  { %1886 = vmatpush2.bf16.msra.mxu1 %v3136_v12  ;;  %1846 = vmatprep.subr.bf16.mxu0 %v3141_v13  ;;  %v3223_v12 = vld [vmem:[#allocation6 + $0x8] ss:$16 sps:$4 sm:$0xff]  }
  0x9c   :  { %1887 = vmatprep.subr.bf16.mxu1 %v3144_v14  ;;  %v3226_v13 = vld [vmem:[#allocation6 + $0x208] ss:$16 sps:$4 sm:$0xff]   ;;  %v3231_v14 = vld [vmem:[#allocation6 + $0x1ec] ss:$16 sps:$4 sm:$0xff]  }
  0x9e   :  { %1847 = vmatpush2.bf16.msra.mxu0 %v3139_v15  ;;  %v3234_v15 = vld [vmem:[#allocation6 + $0x3ec] ss:$16 sps:$4 sm:$0xff]  }
  0x9f   :  { %1888 = vmatpush2.bf16.msra.mxu1 %v3142_v16  ;;  %1848 = vmatprep.subr.bf16.mxu0 %v3147_v17  ;;  %v3229_v16 = vld [vmem:[#allocation6 + $0x1e8] ss:$16 sps:$4 sm:$0xff]  }
  0xa0   :  { %1889 = vmatprep.subr.bf16.mxu1 %v3150_v18  ;;  %v3232_v17 = vld [vmem:[#allocation6 + $0x3e8] ss:$16 sps:$4 sm:$0xff]   ;;  %v3237_v18 = vld [vmem:[#allocation6 + $0x1cc] ss:$16 sps:$4 sm:$0xff]  }
  0xa2   :  { %1849 = vmatpush2.bf16.msra.mxu0 %v3145_v19  ;;  %v3240_v19 = vld [vmem:[#allocation6 + $0x3cc] ss:$16 sps:$4 sm:$0xff]  }
  0xa3   :  { %1890 = vmatpush2.bf16.msra.mxu1 %v3148_v20  ;;  %1850 = vmatprep.subr.bf16.mxu0 %v3153_v21  ;;  %v3235_v20 = vld [vmem:[#allocation6 + $0x1c8] ss:$16 sps:$4 sm:$0xff]  }
  0xa4   :  { %1891 = vmatprep.subr.bf16.mxu1 %v3156_v24  ;;  %v3238_v21 = vld [vmem:[#allocation6 + $0x3c8] ss:$16 sps:$4 sm:$0xff]   ;;  %v3243_v24 = vld [vmem:[#allocation6 + $0x1ac] ss:$16 sps:$4 sm:$0xff]  }
  0xa6   :  { %1851 = vmatpush2.bf16.msra.mxu0 %v3151_v25  ;;  %v3246_v25 = vld [vmem:[#allocation6 + $0x3ac] ss:$16 sps:$4 sm:$0xff]  }
  0xa7   :  { %1892 = vmatpush2.bf16.msra.mxu1 %v3154_v26  ;;  %1852 = vmatprep.subr.bf16.mxu0 %v3159_v27  ;;  %v3241_v26 = vld [vmem:[#allocation6 + $0x1a8] ss:$16 sps:$4 sm:$0xff]  }
  0xa8   :  { %1893 = vmatprep.subr.bf16.mxu1 %v3162_v28  ;;  %v3244_v27 = vld [vmem:[#allocation6 + $0x3a8] ss:$16 sps:$4 sm:$0xff]   ;;  %v3249_v28 = vld [vmem:[#allocation6 + $0x18c] ss:$16 sps:$4 sm:$0xff]  }
  0xaa   :  { %1853 = vmatpush2.bf16.msra.mxu0 %v3157_v29  ;;  %v3252_v29 = vld [vmem:[#allocation6 + $0x38c] ss:$16 sps:$4 sm:$0xff]  }
  0xab   :  { %1894 = vmatpush2.bf16.msra.mxu1 %v3160_v30  ;;  %1854 = vmatprep.subr.bf16.mxu0 %v3165_v31  ;;  %v3247_v30 = vld [vmem:[#allocation6 + $0x188] ss:$16 sps:$4 sm:$0xff]  }
  0xac   :  { %1895 = vmatprep.subr.bf16.mxu1 %v3168_v32  ;;  %v3250_v31 = vld [vmem:[#allocation6 + $0x388] ss:$16 sps:$4 sm:$0xff]   ;;  %v3255_v32 = vld [vmem:[#allocation6 + $0x16c] ss:$16 sps:$4 sm:$0xff]  }
  0xae   :  { %1855 = vmatpush2.bf16.msra.mxu0 %v3163_v33  ;;  %v3258_v33 = vld [vmem:[#allocation6 + $0x36c] ss:$16 sps:$4 sm:$0xff]  }
  0xaf   :  { %1896 = vmatpush2.bf16.msra.mxu1 %v3166_v34  ;;  %1856 = vmatprep.subr.bf16.mxu0 %v3171_v35  ;;  %v3253_v34 = vld [vmem:[#allocation6 + $0x168] ss:$16 sps:$4 sm:$0xff]  }
  0xb0   :  { %1897 = vmatprep.subr.bf16.mxu1 %v3174_v36  ;;  %v3256_v35 = vld [vmem:[#allocation6 + $0x368] ss:$16 sps:$4 sm:$0xff]   ;;  %v3261_v36 = vld [vmem:[#allocation6 + $0x14c] ss:$16 sps:$4 sm:$0xff]  }
  0xb2   :  { %1857 = vmatpush2.bf16.msra.mxu0 %v3169_v37  ;;  %v3264_v37 = vld [vmem:[#allocation6 + $0x34c] ss:$16 sps:$4 sm:$0xff]  }
  0xb3   :  { %1898 = vmatpush2.bf16.msra.mxu1 %v3172_v38  ;;  %1908 = vmatprep.subr.bf16.mxu0 %v3183_v41  ;;  %v3259_v38 = vld [vmem:[#allocation6 + $0x148] ss:$16 sps:$4 sm:$0xff]   ;;  %v3270_v41 = vld [vmem:[#allocation6 + $0x32c] ss:$16 sps:$4 sm:$0xff]  }
  0xb4   :  { %1949 = vmatprep.subr.bf16.mxu1 %v3186_v42  ;;  %v3265_v42 = vld [vmem:[#allocation6 + $0x128] ss:$16 sps:$4 sm:$0xff]  }
  0xb5   :  { %1859 = vmatmul.mubr.bf16.vlgmr.msra.gmra.mxu0 %v3692_v43 }
  0xb6   :  { %1900 = vmatmul.mubr.bf16.vlgmr.msra.gmra.mxu1 %v3694_v44  ;;  %1909 = vmatpush1.bf16.msra.mxu0 %v3181_v45  ;;  %v3268_v45 = vld [vmem:[#allocation6 + $0x328] ss:$16 sps:$4 sm:$0xff]  }
  0xb7   :  { %1950 = vmatpush1.bf16.msra.mxu1 %v3184_v47  ;;  %1910 = vmatprep.subr.bf16.mxu0 %v3189_v48  ;;  %v3273_v47 = vld [vmem:[#allocation6 + $0x10c] ss:$16 sps:$4 sm:$0xff]  }
  0xb8   :  { %1951 = vmatprep.subr.bf16.mxu1 %v3192_v49  ;;  %1940 = vmatprep.mubr.bf16.mxu0 %v3654_v6  ;;  %v3208_v6 = vld [vmem:[#allocation6 + $0x268] ss:$16 sps:$4 sm:$0xff]   ;;  %v3276_v48 = vld [vmem:[#allocation6 + $0x30c] ss:$16 sps:$4 sm:$0xff]  }
  0xb9   :  { %1981 = vmatprep.mubr.bf16.mxu1 %v3656_v9  ;;  %v3213_v9 = vld [vmem:[#allocation6 + $0x4c] ss:$16 sps:$4 sm:$0xff]   ;;  %v3271_v49 = vld [vmem:[#allocation6 + $0x108] ss:$16 sps:$4 sm:$0xff]  }
  0xba   :  { %1911 = vmatpush1.bf16.msra.mxu0 %v3187_v50  ;;  %v3274_v50 = vld [vmem:[#allocation6 + $0x308] ss:$16 sps:$4 sm:$0xff]  }
  0xbb   :  { %1952 = vmatpush1.bf16.msra.mxu1 %v3190_v51  ;;  %1912 = vmatprep.subr.bf16.mxu0 %v3195_v52  ;;  %v3279_v51 = vld [vmem:[#allocation6 + $0x4ec] ss:$16 sps:$4 sm:$0xff]  }
  0xbc   :  { %1953 = vmatprep.subr.bf16.mxu1 %v3198_v54  ;;  %v3282_v52 = vld [vmem:[#allocation6 + $0x6ec] ss:$16 sps:$4 sm:$0xff]   ;;  %v3277_v54 = vld [vmem:[#allocation6 + $0x4e8] ss:$16 sps:$4 sm:$0xff]  }
  0xbe   :  { %1913 = vmatpush1.bf16.msra.mxu0 %v3193_v55  ;;  %v3280_v55 = vld [vmem:[#allocation6 + $0x6e8] ss:$16 sps:$4 sm:$0xff]  }
  0xbf   :  { %1954 = vmatpush1.bf16.msra.mxu1 %v3196_v56  ;;  %1914 = vmatprep.subr.bf16.mxu0 %v3201_v57  ;;  %v3285_v56 = vld [vmem:[#allocation6 + $0x4cc] ss:$16 sps:$4 sm:$0xff]  }
  0xc0   :  { %1955 = vmatprep.subr.bf16.mxu1 %v3204_v58  ;;  %v3288_v57 = vld [vmem:[#allocation6 + $0x6cc] ss:$16 sps:$4 sm:$0xff]   ;;  %v3283_v58 = vld [vmem:[#allocation6 + $0x4c8] ss:$16 sps:$4 sm:$0xff]  }
  0xc2   :  { %1915 = vmatpush1.bf16.msra.mxu0 %v3199_v59  ;;  %v3286_v59 = vld [vmem:[#allocation6 + $0x6c8] ss:$16 sps:$4 sm:$0xff]  }
  0xc3   :  { %1956 = vmatpush1.bf16.msra.mxu1 %v3202_v60  ;;  %1916 = vmatprep.subr.bf16.mxu0 %v3207_v61  ;;  %v3291_v60 = vld [vmem:[#allocation6 + $0x4ac] ss:$16 sps:$4 sm:$0xff]  }
  0xc4   :  { %1957 = vmatprep.subr.bf16.mxu1 %v3210_v62  ;;  %v3294_v61 = vld [vmem:[#allocation6 + $0x6ac] ss:$16 sps:$4 sm:$0xff]   ;;  %v3289_v62 = vld [vmem:[#allocation6 + $0x4a8] ss:$16 sps:$4 sm:$0xff]  }
  0xc6   :  { %1917 = vmatpush1.bf16.msra.mxu0 %v3205_v63  ;;  %v3292_v63 = vld [vmem:[#allocation6 + $0x6a8] ss:$16 sps:$4 sm:$0xff]  }
  0xc7   :  { %1958 = vmatpush1.bf16.msra.mxu1 %v3208_v6  ;;  %1918 = vmatprep.subr.bf16.mxu0 %v3213_v9  ;;  %v3297_v6 = vld [vmem:[#allocation6 + $0x48c] ss:$16 sps:$4 sm:$0xff]  }
  0xc8   :  { %1959 = vmatprep.subr.bf16.mxu1 %v3216_v0  ;;  %v3300_v9 = vld [vmem:[#allocation6 + $0x68c] ss:$16 sps:$4 sm:$0xff]  }
  0xc9   :  { %v3303_v0 = vld [vmem:[#allocation6 + $0x46c] ss:$16 sps:$4 sm:$0xff]  }
  0xca   :  { %1919 = vmatpush1.bf16.msra.mxu0 %v3211_v1  ;;  %v3306_v1 = vld [vmem:[#allocation6 + $0x66c] ss:$16 sps:$4 sm:$0xff]  }
  0xcb   :  { %1960 = vmatpush1.bf16.msra.mxu1 %v3214_v2  ;;  %1920 = vmatprep.subr.bf16.mxu0 %v3219_v3  ;;  %v3301_v2 = vld [vmem:[#allocation6 + $0x468] ss:$16 sps:$4 sm:$0xff]   ;;  %v3312_v3 = vld [vmem:[#allocation6 + $0x64c] ss:$16 sps:$4 sm:$0xff]  }
  0xcc   :  { %1961 = vmatprep.subr.bf16.mxu1 %v3222_v4  ;;  %v3307_v4 = vld [vmem:[#allocation6 + $0x448] ss:$16 sps:$4 sm:$0xff]  }
  0xce   :  { %1921 = vmatpush1.bf16.msra.mxu0 %v3217_v5  ;;  %v3310_v5 = vld [vmem:[#allocation6 + $0x648] ss:$16 sps:$4 sm:$0xff]  }
  0xcf   :  { %1962 = vmatpush1.bf16.msra.mxu1 %v3220_v8  ;;  %1922 = vmatprep.subr.bf16.mxu0 %v3225_v53  ;;  %v3315_v8 = vld [vmem:[#allocation6 + $0x42c] ss:$16 sps:$4 sm:$0xff]  }
  0xd0   :  { %1963 = vmatprep.subr.bf16.mxu1 %v3228_v11  ;;  %v3318_v53 = vld [vmem:[#allocation6 + $0x62c] ss:$16 sps:$4 sm:$0xff]   ;;  %v3313_v11 = vld [vmem:[#allocation6 + $0x428] ss:$16 sps:$4 sm:$0xff]  }
  0xd2   :  { %1923 = vmatpush1.bf16.msra.mxu0 %v3223_v12  ;;  %v3316_v12 = vld [vmem:[#allocation6 + $0x628] ss:$16 sps:$4 sm:$0xff]  }
  0xd3   :  { %1964 = vmatpush1.bf16.msra.mxu1 %v3226_v13  ;;  %1924 = vmatprep.subr.bf16.mxu0 %v3231_v14  ;;  %v3321_v13 = vld [vmem:[#allocation6 + $0x40c] ss:$16 sps:$4 sm:$0xff]  }
  0xd4   :  { %1965 = vmatprep.subr.bf16.mxu1 %v3234_v15  ;;  %v3324_v14 = vld [vmem:[#allocation6 + $0x60c] ss:$16 sps:$4 sm:$0xff]   ;;  %v3319_v15 = vld [vmem:[#allocation6 + $0x408] ss:$16 sps:$4 sm:$0xff]  }
  0xd6   :  { %1925 = vmatpush2.bf16.msra.mxu0 %v3229_v16  ;;  %v3322_v16 = vld [vmem:[#allocation6 + $0x608] ss:$16 sps:$4 sm:$0xff]  }
  0xd7   :  { %1966 = vmatpush2.bf16.msra.mxu1 %v3232_v17  ;;  %1926 = vmatprep.subr.bf16.mxu0 %v3237_v18  ;;  %v3327_v17 = vld [vmem:[#allocation6 + $0x5ec] ss:$16 sps:$4 sm:$0xff]  }
  0xd8   :  { %1967 = vmatprep.subr.bf16.mxu1 %v3240_v19  ;;  %v3330_v18 = vld [vmem:[#allocation6 + $0x7ec] ss:$16 sps:$4 sm:$0xff]   ;;  %v3325_v19 = vld [vmem:[#allocation6 + $0x5e8] ss:$16 sps:$4 sm:$0xff]  }
  0xda   :  { %1927 = vmatpush2.bf16.msra.mxu0 %v3235_v20  ;;  %v3328_v20 = vld [vmem:[#allocation6 + $0x7e8] ss:$16 sps:$4 sm:$0xff]  }
  0xdb   :  { %1968 = vmatpush2.bf16.msra.mxu1 %v3238_v21  ;;  %1928 = vmatprep.subr.bf16.mxu0 %v3243_v24  ;;  %v3333_v21 = vld [vmem:[#allocation6 + $0x5cc] ss:$16 sps:$4 sm:$0xff]  }
  0xdc   :  { %1969 = vmatprep.subr.bf16.mxu1 %v3246_v25  ;;  %v3336_v24 = vld [vmem:[#allocation6 + $0x7cc] ss:$16 sps:$4 sm:$0xff]   ;;  %v3331_v25 = vld [vmem:[#allocation6 + $0x5c8] ss:$16 sps:$4 sm:$0xff]  }
  0xde   :  { %1929 = vmatpush2.bf16.msra.mxu0 %v3241_v26  ;;  %v3334_v26 = vld [vmem:[#allocation6 + $0x7c8] ss:$16 sps:$4 sm:$0xff]  }
  0xdf   :  { %1970 = vmatpush2.bf16.msra.mxu1 %v3244_v27  ;;  %1930 = vmatprep.subr.bf16.mxu0 %v3249_v28  ;;  %v3339_v27 = vld [vmem:[#allocation6 + $0x5ac] ss:$16 sps:$4 sm:$0xff]  }
  0xe0   :  { %1971 = vmatprep.subr.bf16.mxu1 %v3252_v29  ;;  %v3342_v28 = vld [vmem:[#allocation6 + $0x7ac] ss:$16 sps:$4 sm:$0xff]   ;;  %v3337_v29 = vld [vmem:[#allocation6 + $0x5a8] ss:$16 sps:$4 sm:$0xff]  }
  0xe2   :  { %1931 = vmatpush2.bf16.msra.mxu0 %v3247_v30  ;;  %v3340_v30 = vld [vmem:[#allocation6 + $0x7a8] ss:$16 sps:$4 sm:$0xff]  }
  0xe3   :  { %1972 = vmatpush2.bf16.msra.mxu1 %v3250_v31  ;;  %1932 = vmatprep.subr.bf16.mxu0 %v3255_v32  ;;  %v3345_v31 = vld [vmem:[#allocation6 + $0x58c] ss:$16 sps:$4 sm:$0xff]  }
  0xe4   :  { %1973 = vmatprep.subr.bf16.mxu1 %v3258_v33  ;;  %v3348_v32 = vld [vmem:[#allocation6 + $0x78c] ss:$16 sps:$4 sm:$0xff]   ;;  %v3343_v33 = vld [vmem:[#allocation6 + $0x588] ss:$16 sps:$4 sm:$0xff]  }
  0xe6   :  { %1933 = vmatpush2.bf16.msra.mxu0 %v3253_v34  ;;  %v3346_v34 = vld [vmem:[#allocation6 + $0x788] ss:$16 sps:$4 sm:$0xff]  }
  0xe7   :  { %1974 = vmatpush2.bf16.msra.mxu1 %v3256_v35  ;;  %1934 = vmatprep.subr.bf16.mxu0 %v3261_v36  ;;  %v3351_v35 = vld [vmem:[#allocation6 + $0x56c] ss:$16 sps:$4 sm:$0xff]  }
  0xe8   :  { %1975 = vmatprep.subr.bf16.mxu1 %v3264_v37  ;;  %v3354_v36 = vld [vmem:[#allocation6 + $0x76c] ss:$16 sps:$4 sm:$0xff]   ;;  %v3349_v37 = vld [vmem:[#allocation6 + $0x568] ss:$16 sps:$4 sm:$0xff]  }
  0xea   :  { %1935 = vmatpush2.bf16.msra.mxu0 %v3259_v38  ;;  %v3352_v38 = vld [vmem:[#allocation6 + $0x768] ss:$16 sps:$4 sm:$0xff]  }
  0xeb   :  { %1976 = vmatpush2.bf16.msra.mxu1 %v3262_v39  ;;  %1936 = vmatprep.subr.bf16.mxu0 %v3267_v40  ;;  %v3357_v39 = vld [vmem:[#allocation6 + $0x54c] ss:$16 sps:$4 sm:$0xff]  }
  0xec   :  { %1977 = vmatprep.subr.bf16.mxu1 %v3270_v41  ;;  %v3360_v40 = vld [vmem:[#allocation6 + $0x74c] ss:$16 sps:$4 sm:$0xff]   ;;  %v3355_v41 = vld [vmem:[#allocation6 + $0x548] ss:$16 sps:$4 sm:$0xff]  }
  0xee   :  { %1937 = vmatpush2.bf16.msra.mxu0 %v3265_v42  ;;  %v3358_v42 = vld [vmem:[#allocation6 + $0x748] ss:$16 sps:$4 sm:$0xff]  }
  0xef   :  { %1978 = vmatpush2.bf16.msra.mxu1 %v3268_v45  ;;  %1938 = vmatprep.subr.bf16.mxu0 %v3273_v47  ;;  %v3363_v45 = vld [vmem:[#allocation6 + $0x52c] ss:$16 sps:$4 sm:$0xff]  }
  0xf0   :  { %1979 = vmatprep.subr.bf16.mxu1 %v3276_v48  ;;  %v3366_v47 = vld [vmem:[#allocation6 + $0x72c] ss:$16 sps:$4 sm:$0xff]   ;;  %v3361_v48 = vld [vmem:[#allocation6 + $0x528] ss:$16 sps:$4 sm:$0xff]  }
  0xf2   :  { %1939 = vmatpush2.bf16.msra.mxu0 %v3271_v49  ;;  %v3364_v49 = vld [vmem:[#allocation6 + $0x728] ss:$16 sps:$4 sm:$0xff]  }
  0xf3   :  { %1980 = vmatpush2.bf16.msra.mxu1 %v3274_v50  ;;  %1990 = vmatprep.subr.bf16.mxu0 %v3279_v51  ;;  %v3369_v50 = vld [vmem:[#allocation6 + $0x50c] ss:$16 sps:$4 sm:$0xff]  }
  0xf4   :  { %2031 = vmatprep.subr.bf16.mxu1 %v3282_v52  ;;  %v3372_v51 = vld [vmem:[#allocation6 + $0x70c] ss:$16 sps:$4 sm:$0xff]   ;;  %v3367_v52 = vld [vmem:[#allocation6 + $0x508] ss:$16 sps:$4 sm:$0xff]  }
  0xf5   :  { %1941 = vmatmul.mubr.bf16.vlgmr.msra.gmra.mxu0 %v3660_v22  ;;  %v3295_v22 = vld [vmem:[#allocation6 + $0x488] ss:$16 sps:$4 sm:$0xff]  }
  0xf6   :  { %1982 = vmatmul.mubr.bf16.vlgmr.msra.gmra.mxu1 %v3662_v23  ;;  %1991 = vmatpush1.bf16.msra.mxu0 %v3277_v54  ;;  %v3298_v23 = vld [vmem:[#allocation6 + $0x688] ss:$16 sps:$4 sm:$0xff]  }
  0xf7   :  { %2032 = vmatpush1.bf16.msra.mxu1 %v3280_v55  ;;  %1992 = vmatprep.subr.bf16.mxu0 %v3285_v56  ;;  %v3370_v54 = vld [vmem:[#allocation6 + $0x708] ss:$16 sps:$4 sm:$0xff]   ;;  %v3373_v56 = vld [vmem:[#allocation9 + $0x70] ss:$8 sps:$4 sm:$0xff]  }
  0xf8   :  { %2033 = vmatprep.subr.bf16.mxu1 %v3288_v57  ;;  %2022 = vmatprep.mubr.bf16.mxu0 %v3682_v7  ;;  %v3304_v7 = vld [vmem:[#allocation6 + $0x668] ss:$16 sps:$4 sm:$0xff]  }
  0xf9   :  { %2063 = vmatprep.mubr.bf16.mxu1 %v3684_v10  ;;  %v3309_v10 = vld [vmem:[#allocation6 + $0x44c] ss:$16 sps:$4 sm:$0xff]   ;;  %v3375_v55 = vld [vmem:[#allocation9 + $0x74] ss:$8 sps:$4 sm:$0xff]   ;;  %v3378_v57 = vld [vmem:[#allocation9 + $0x64] ss:$8 sps:$4 sm:$0xff]  }
  0xfa   :  { %1993 = vmatpush1.bf16.msra.mxu0 %v3283_v58 }
  0xfb   :  { %2034 = vmatpush1.bf16.msra.mxu1 %v3286_v59  ;;  %1994 = vmatprep.subr.bf16.mxu0 %v3291_v60  ;;  %v3376_v60 = vld [vmem:[#allocation9 + $0x60] ss:$8 sps:$4 sm:$0xff]  }
  0xfc   :  { %2035 = vmatprep.subr.bf16.mxu1 %v3294_v61 }
  0xfe   :  { %1995 = vmatpush1.bf16.msra.mxu0 %v3289_v62 }
  0xff   :  { %2036 = vmatpush1.bf16.msra.mxu1 %v3292_v63  ;;  %1996 = vmatprep.subr.bf16.mxu0 %v3297_v6  ;;  %v3381_v63 = vld [vmem:[#allocation9 + $0x54] ss:$8 sps:$4 sm:$0xff]  }
 0x100   :  { %2037 = vmatprep.subr.bf16.mxu1 %v3300_v9 }
 0x102   :  { %1997 = vmatpush1.bf16.msra.mxu0 %v3295_v22  ;;  %v3379_v22 = vld [vmem:[#allocation9 + $0x50] ss:$8 sps:$4 sm:$0xff]  }
 0x103   :  { %2038 = vmatpush1.bf16.msra.mxu1 %v3298_v23  ;;  %1998 = vmatprep.subr.bf16.mxu0 %v3303_v0 }
 0x104   :  { %2039 = vmatprep.subr.bf16.mxu1 %v3306_v1  ;;  %v3384_v1 = vld [vmem:[#allocation9 + $0x44] ss:$8 sps:$4 sm:$0xff]  }
 0x106   :  { %1999 = vmatpush1.bf16.msra.mxu0 %v3301_v2  ;;  %v3421_v2 = vld [vmem:[#allocation9 + $0x170] ss:$8 sps:$4 sm:$0xff]  }
 0x107   :  { %2040 = vmatpush1.bf16.msra.mxu1 %v3304_v7  ;;  %2000 = vmatprep.subr.bf16.mxu0 %v3309_v10  ;;  %v3426_v7 = vld [vmem:[#allocation9 + $0x164] ss:$8 sps:$4 sm:$0xff]   ;;  %v3424_v10 = vld [vmem:[#allocation9 + $0x160] ss:$8 sps:$4 sm:$0xff]  }
 0x108   :  { %2041 = vmatprep.subr.bf16.mxu1 %v3312_v3  ;;  %v3387_v3 = vld [vmem:[#allocation9 + $0x34] ss:$8 sps:$4 sm:$0xff]  }
 0x10a   :  { %2001 = vmatpush1.bf16.msra.mxu0 %v3307_v4  ;;  %v3429_v4 = vld [vmem:[#allocation9 + $0x154] ss:$8 sps:$4 sm:$0xff]  }
 0x10b   :  { %2042 = vmatpush1.bf16.msra.mxu1 %v3310_v5  ;;  %2002 = vmatprep.subr.bf16.mxu0 %v3315_v8  ;;  %v3385_v5 = vld [vmem:[#allocation9 + $0x30] ss:$8 sps:$4 sm:$0xff]  }
 0x10c   :  { %2043 = vmatprep.subr.bf16.mxu1 %v3318_v53  ;;  %v3427_v8 = vld [vmem:[#allocation9 + $0x150] ss:$8 sps:$4 sm:$0xff]   ;;  %v3390_v53 = vld [vmem:[#allocation9 + $0x24] ss:$8 sps:$4 sm:$0xff]  }
 0x10e   :  { %2003 = vmatpush1.bf16.msra.mxu0 %v3313_v11  ;;  %v3432_v11 = vld [vmem:[#allocation9 + $0x144] ss:$8 sps:$4 sm:$0xff]  }
 0x10f   :  { %2044 = vmatpush1.bf16.msra.mxu1 %v3316_v12  ;;  %2004 = vmatprep.subr.bf16.mxu0 %v3321_v13  ;;  %v3388_v12 = vld [vmem:[#allocation9 + $0x20] ss:$8 sps:$4 sm:$0xff]  }
 0x110   :  { %2045 = vmatprep.subr.bf16.mxu1 %v3324_v14  ;;  %v3430_v13 = vld [vmem:[#allocation9 + $0x140] ss:$8 sps:$4 sm:$0xff]   ;;  %v3393_v14 = vld [vmem:[#allocation9 + $0x14] ss:$8 sps:$4 sm:$0xff]  }
 0x112   :  { %2005 = vmatpush1.bf16.msra.mxu0 %v3319_v15  ;;  %v3435_v15 = vld [vmem:[#allocation9 + $0x134] ss:$8 sps:$4 sm:$0xff]  }
 0x113   :  { %2046 = vmatpush1.bf16.msra.mxu1 %v3322_v16  ;;  %2006 = vmatprep.subr.bf16.mxu0 %v3327_v17  ;;  %v3391_v16 = vld [vmem:[#allocation9 + $0x10] ss:$8 sps:$4 sm:$0xff]  }
 0x114   :  { %2047 = vmatprep.subr.bf16.mxu1 %v3330_v18  ;;  %v3433_v17 = vld [vmem:[#allocation9 + $0x130] ss:$8 sps:$4 sm:$0xff]   ;;  %v3396_v18 = vld [vmem:[#allocation9 + $0x4] ss:$8 sps:$4 sm:$0xff]  }
 0x116   :  { %2007 = vmatpush2.bf16.msra.mxu0 %v3325_v19  ;;  %v3438_v19 = vld [vmem:[#allocation9 + $0x124] ss:$8 sps:$4 sm:$0xff]  }
 0x117   :  { %2048 = vmatpush2.bf16.msra.mxu1 %v3328_v20  ;;  %2008 = vmatprep.subr.bf16.mxu0 %v3333_v21  ;;  %v3394_v20 = vld [vmem:[#allocation9] ss:$8 sps:$4 sm:$0xff]  }
 0x118   :  { %2049 = vmatprep.subr.bf16.mxu1 %v3336_v24  ;;  %v3436_v21 = vld [vmem:[#allocation9 + $0x120] ss:$8 sps:$4 sm:$0xff]   ;;  %v3399_v24 = vld [vmem:[#allocation9 + $0xf4] ss:$8 sps:$4 sm:$0xff]  }
 0x11a   :  { %2009 = vmatpush2.bf16.msra.mxu0 %v3331_v25  ;;  %v3441_v25 = vld [vmem:[#allocation9 + $0x114] ss:$8 sps:$4 sm:$0xff]  }
 0x11b   :  { %2050 = vmatpush2.bf16.msra.mxu1 %v3334_v26  ;;  %2010 = vmatprep.subr.bf16.mxu0 %v3339_v27  ;;  %v3397_v26 = vld [vmem:[#allocation9 + $0xf0] ss:$8 sps:$4 sm:$0xff]  }
 0x11c   :  { %2051 = vmatprep.subr.bf16.mxu1 %v3342_v28  ;;  %v3439_v27 = vld [vmem:[#allocation9 + $0x110] ss:$8 sps:$4 sm:$0xff]   ;;  %v3402_v28 = vld [vmem:[#allocation9 + $0xe4] ss:$8 sps:$4 sm:$0xff]  }
 0x11e   :  { %2011 = vmatpush2.bf16.msra.mxu0 %v3337_v29  ;;  %v3444_v29 = vld [vmem:[#allocation9 + $0x104] ss:$8 sps:$4 sm:$0xff]  }
 0x11f   :  { %2052 = vmatpush2.bf16.msra.mxu1 %v3340_v30  ;;  %2012 = vmatprep.subr.bf16.mxu0 %v3345_v31  ;;  %v3400_v30 = vld [vmem:[#allocation9 + $0xe0] ss:$8 sps:$4 sm:$0xff]  }
 0x120   :  { %2053 = vmatprep.subr.bf16.mxu1 %v3348_v32  ;;  %v3442_v31 = vld [vmem:[#allocation9 + $0x100] ss:$8 sps:$4 sm:$0xff]   ;;  %v3405_v32 = vld [vmem:[#allocation9 + $0xd4] ss:$8 sps:$4 sm:$0xff]  }
 0x122   :  { %2013 = vmatpush2.bf16.msra.mxu0 %v3343_v33  ;;  %v3447_v33 = vld [vmem:[#allocation9 + $0x1f4] ss:$8 sps:$4 sm:$0xff]  }
 0x123   :  { %2054 = vmatpush2.bf16.msra.mxu1 %v3346_v34  ;;  %2014 = vmatprep.subr.bf16.mxu0 %v3351_v35  ;;  %v3403_v34 = vld [vmem:[#allocation9 + $0xd0] ss:$8 sps:$4 sm:$0xff]  }
 0x124   :  { %2055 = vmatprep.subr.bf16.mxu1 %v3354_v36  ;;  %v3445_v35 = vld [vmem:[#allocation9 + $0x1f0] ss:$8 sps:$4 sm:$0xff]   ;;  %v3408_v36 = vld [vmem:[#allocation9 + $0xc4] ss:$8 sps:$4 sm:$0xff]  }
 0x126   :  { %2015 = vmatpush2.bf16.msra.mxu0 %v3349_v37  ;;  %v3450_v37 = vld [vmem:[#allocation9 + $0x1e4] ss:$8 sps:$4 sm:$0xff]  }
 0x127   :  { %2056 = vmatpush2.bf16.msra.mxu1 %v3352_v38  ;;  %2016 = vmatprep.subr.bf16.mxu0 %v3357_v39  ;;  %v3406_v38 = vld [vmem:[#allocation9 + $0xc0] ss:$8 sps:$4 sm:$0xff]  }
 0x128   :  { %2057 = vmatprep.subr.bf16.mxu1 %v3360_v40  ;;  %v3448_v39 = vld [vmem:[#allocation9 + $0x1e0] ss:$8 sps:$4 sm:$0xff]   ;;  %v3411_v40 = vld [vmem:[#allocation9 + $0xb4] ss:$8 sps:$4 sm:$0xff]  }
 0x12a   :  { %2017 = vmatpush2.bf16.msra.mxu0 %v3355_v41  ;;  %v3453_v41 = vld [vmem:[#allocation9 + $0x1d4] ss:$8 sps:$4 sm:$0xff]  }
 0x12b   :  { %2058 = vmatpush2.bf16.msra.mxu1 %v3358_v42  ;;  %2018 = vmatprep.subr.bf16.mxu0 %v3363_v45  ;;  %v3409_v42 = vld [vmem:[#allocation9 + $0xb0] ss:$8 sps:$4 sm:$0xff]  }
 0x12c   :  { %2059 = vmatprep.subr.bf16.mxu1 %v3366_v47  ;;  %v3451_v45 = vld [vmem:[#allocation9 + $0x1d0] ss:$8 sps:$4 sm:$0xff]   ;;  %v3414_v47 = vld [vmem:[#allocation9 + $0xa4] ss:$8 sps:$4 sm:$0xff]  }
 0x12e   :  { %2019 = vmatpush2.bf16.msra.mxu0 %v3361_v48  ;;  %v3456_v48 = vld [vmem:[#allocation9 + $0x1c4] ss:$8 sps:$4 sm:$0xff]  }
 0x12f   :  { %2060 = vmatpush2.bf16.msra.mxu1 %v3364_v49  ;;  %2020 = vmatprep.subr.bf16.mxu0 %v3369_v50  ;;  %v3412_v49 = vld [vmem:[#allocation9 + $0xa0] ss:$8 sps:$4 sm:$0xff]  }
 0x130   :  { %2061 = vmatprep.subr.bf16.mxu1 %v3372_v51  ;;  %v3454_v50 = vld [vmem:[#allocation9 + $0x1c0] ss:$8 sps:$4 sm:$0xff]   ;;  %v3417_v51 = vld [vmem:[#allocation9 + $0x94] ss:$8 sps:$4 sm:$0xff]  }
 0x132   :  { %2021 = vmatpush2.bf16.msra.mxu0 %v3367_v52  ;;  %v3459_v52 = vld [vmem:[#allocation9 + $0x1b4] ss:$8 sps:$4 sm:$0xff]  }
 0x133   :  { %2062 = vmatpush2.bf16.msra.mxu1 %v3370_v54  ;;  %2480 = vmatprep.subr.bf16.mxu0 %v3375_v55  ;;  %v446_v54 = vsub.s32 0, %v3645_v46  ;;  %v3715_v55 = vld [vmem:[#allocation8] sm:$0xf] }
 0x135   :  { %v3704_v58 = vpop.f32.mrf.mxu0  ;;  %2023 = vmatmul.mubr.bf16.vlgmr.msra.gmra.mxu0 %v3692_v43  ;;  %v3423_v43 = vld [vmem:[#allocation9 + $0x174] ss:$8 sps:$4 sm:$0xff]  }
 0x136   :  { %v3706_v59 = vpop.f32.mrf.mxu1  ;;  %2064 = vmatmul.mubr.bf16.vlgmr.msra.gmra.mxu1 %v3694_v44  ;;  %2481 = vmatpush1.bf16.msra.mxu0 %v3373_v56  ;;  %v3382_v44 = vld [vmem:[#allocation9 + $0x40] ss:$8 sps:$4 sm:$0xff]   ;;  %v450_v56 = vsub.s32 1, %v3645_v46 }
 0x137   :  { %v3710_v61 = vpop.f32.mrf.mxu0  ;;  %2482 = vmatprep.subr.bf16.mxu0 %v3378_v57  ;;  %2521 = vmatprep.subr.bf16.mxu1 %v3423_v43  ;;  %v3415_v57 = vld [vmem:[#allocation9 + $0x90] ss:$8 sps:$4 sm:$0xff]  }
 0x138   :  { %v3712_v62 = vpop.f32.mrf.mxu1  ;;  %2522 = vmatpush1.bf16.msra.mxu1 %v3421_v2 }
 0x139   :  { %v1782_v6 = vpop.f32.mrf.mxu0  ;;  %2523 = vmatprep.subr.bf16.mxu1 %v3426_v7  ;;  %v3462_v7 = vld [vmem:[#allocation9 + $0x1a4] ss:$8 sps:$4 sm:$0xff]  }
 0x13a   :  { %v1823_v9 = vpop.f32.mrf.mxu1  ;;  %2483 = vmatpush1.bf16.msra.mxu0 %v3376_v60  ;;  %v3457_v60 = vld [vmem:[#allocation9 + $0x1b0] ss:$8 sps:$4 sm:$0xff]   ;;  %v447_v6 = vrot.slane %v3715_v55, %v446_v54 }
 0x13b   :  { %v1783_v23 = vpop.f32.mrf.mxu0  ;;  %2484 = vmatprep.subr.bf16.mxu0 %v3381_v63  ;;  %v3420_v63 = vld [vmem:[#allocation9 + $0x84] ss:$8 sps:$4 sm:$0xff]   ;;  %v451_v9 = vrot.slane %v3715_v55, %v450_v56 }
 0x13c   :  { %v1824_v0 = vpop.f32.mrf.mxu1  ;;  %2524 = vmatpush1.bf16.msra.mxu1 %v3424_v10  ;;  %v1779_v23 = vadd.f32 %v3704_v58, %v447_v6 }
 0x13d   :  { %2525 = vmatprep.subr.bf16.mxu1 %v3429_v4  ;;  %v1781_v0 = vadd.f32 %v3710_v61, %v451_v9 }
 0x13e   :  { %2485 = vmatpush1.bf16.msra.mxu0 %v3379_v22  ;;  %v3418_v22 = vld [vmem:[#allocation9 + $0x80] ss:$8 sps:$4 sm:$0xff]  }
 0x13f   :  { %2486 = vmatprep.subr.bf16.mxu0 %v3384_v1  ;;  %v1820_v1 = vadd.f32 %v3706_v59, %v1779_v23 }
 0x140   :  { %2526 = vmatpush1.bf16.msra.mxu1 %v3427_v8 }
 0x141   :  { %2527 = vmatprep.subr.bf16.mxu1 %v3432_v11 }
 0x142   :  { %2487 = vmatpush1.bf16.msra.mxu0 %v3382_v44  ;;  %v1822_v44 = vadd.f32 %v3712_v62, %v1781_v0 }
 0x143   :  { %2488 = vmatprep.subr.bf16.mxu0 %v3387_v3  ;;  %v3460_v3 = vld [vmem:[#allocation9 + $0x1a0] ss:$8 sps:$4 sm:$0xff]  }
 0x144   :  { %2528 = vmatpush1.bf16.msra.mxu1 %v3430_v13 }
 0x145   :  { %2529 = vmatprep.subr.bf16.mxu1 %v3435_v15 }
 0x146   :  { %2489 = vmatpush1.bf16.msra.mxu0 %v3385_v5 }
 0x147   :  { %2490 = vmatprep.subr.bf16.mxu0 %v3390_v53 }
 0x148   :  { %2530 = vmatpush1.bf16.msra.mxu1 %v3433_v17  ;;  %v3468_v17 = vld [vmem:[#allocation9 + $0x184] ss:$8 sps:$4 sm:$0xff]  }
 0x149   :  { %2531 = vmatprep.subr.bf16.mxu1 %v3438_v19  ;;  %v3466_v19 = vld [vmem:[#allocation9 + $0x180] ss:$8 sps:$4 sm:$0xff]  }
 0x14a   :  { %2491 = vmatpush1.bf16.msra.mxu0 %v3388_v12  ;;  %v3465_v12 = vld [vmem:[#allocation9 + $0x194] ss:$8 sps:$4 sm:$0xff]  }
 0x14b   :  { %2492 = vmatprep.subr.bf16.mxu0 %v3393_v14  ;;  %v3463_v14 = vld [vmem:[#allocation9 + $0x190] ss:$8 sps:$4 sm:$0xff]  }
 0x14c   :  { %2532 = vmatpush1.bf16.msra.mxu1 %v3436_v21 }
 0x14d   :  { %2533 = vmatprep.subr.bf16.mxu1 %v3441_v25 }
 0x14e   :  { %2493 = vmatpush1.bf16.msra.mxu0 %v3391_v16 }
 0x14f   :  { %2494 = vmatprep.subr.bf16.mxu0 %v3396_v18 }
 0x150   :  { %2534 = vmatpush1.bf16.msra.mxu1 %v3439_v27 }
 0x151   :  { %2535 = vmatprep.subr.bf16.mxu1 %v3444_v29 }
 0x152   :  { %2495 = vmatpush1.bf16.msra.mxu0 %v3394_v20 }
 0x153   :  { %2496 = vmatprep.subr.bf16.mxu0 %v3399_v24 }
 0x154   :  { %2536 = vmatpush1.bf16.msra.mxu1 %v3442_v31 }
 0x155   :  { %2537 = vmatprep.subr.bf16.mxu1 %v3447_v33  ;;  %v458_v33 = vsub.s32 3, %v3645_v46 }
 0x156   :  { %2497 = vmatpush2.bf16.msra.mxu0 %v3397_v26 }
 0x157   :  { %2498 = vmatprep.subr.bf16.mxu0 %v3402_v28 }
 0x158   :  { %2538 = vmatpush2.bf16.msra.mxu1 %v3445_v35  ;;  %v459_v35 = vrot.slane %v3715_v55, %v458_v33 }
 0x159   :  { %2539 = vmatprep.subr.bf16.mxu1 %v3450_v37 }
 0x15a   :  { %2499 = vmatpush2.bf16.msra.mxu0 %v3400_v30 }
 0x15b   :  { %2500 = vmatprep.subr.bf16.mxu0 %v3405_v32  ;;  %v454_v32 = vsub.s32 2, %v3645_v46  ;;  %v2617_v46 = vstv %s3754_s6 }
 0x15c   :  { %2540 = vmatpush2.bf16.msra.mxu1 %v3448_v39 }
 0x15d   :  { %2541 = vmatprep.subr.bf16.mxu1 %v3453_v41 }
 0x15e   :  { %2501 = vmatpush2.bf16.msra.mxu0 %v3403_v34  ;;  %v455_v34 = vrot.slane %v3715_v55, %v454_v32 }
 0x15f   :  { %2502 = vmatprep.subr.bf16.mxu0 %v3408_v36 }
 0x160   :  { %2542 = vmatpush2.bf16.msra.mxu1 %v3451_v45 }
 0x161   :  { %2543 = vmatprep.subr.bf16.mxu1 %v3456_v48 }
 0x162   :  { %2503 = vmatpush2.bf16.msra.mxu0 %v3406_v38 }
 0x163   :  { %2504 = vmatprep.subr.bf16.mxu0 %v3411_v40 }
 0x164   :  { %2544 = vmatpush2.bf16.msra.mxu1 %v3454_v50 }
 0x165   :  { %2545 = vmatprep.subr.bf16.mxu1 %v3459_v52 }
 0x166   :  { %2505 = vmatpush2.bf16.msra.mxu0 %v3409_v42 }
 0x167   :  { %2506 = vmatprep.subr.bf16.mxu0 %v3414_v47 }
 0x168   :  { %2546 = vmatpush2.bf16.msra.mxu1 %v3457_v60 }
 0x169   :  { %2547 = vmatprep.subr.bf16.mxu1 %v3462_v7  ;;  %v2566_v7 = vld [vmem:[%s3753_s5] sm:$0xff] }
 0x16a   :  { %2507 = vmatpush2.bf16.msra.mxu0 %v3412_v49 }
 0x16b   :  { %2508 = vmatprep.subr.bf16.mxu0 %v3417_v51 }
 0x16c   :  { %2548 = vmatpush2.bf16.msra.mxu1 %v3460_v3 }
 0x16d   :  { %2549 = vmatprep.subr.bf16.mxu1 %v3465_v12 }
 0x16e   :  { %2509 = vmatpush2.bf16.msra.mxu0 %v3415_v57 }
 0x16f   :  { %2510 = vmatprep.subr.bf16.mxu0 %v3420_v63 }
 0x170   :  { %2550 = vmatpush2.bf16.msra.mxu1 %v3463_v14 }
 0x171   :  { %2551 = vmatprep.subr.bf16.mxu1 %v3468_v17 }
 0x172   :  { %2511 = vmatpush2.bf16.msra.mxu0 %v3418_v22 }
 0x174   :  { %2552 = vmatpush2.bf16.msra.mxu1 %v3466_v19 }
 0x175   :  { %v1860_v2 = vpop.f32.mrf.mxu0 }
 0x176   :  { %v1901_v43 = vpop.f32.mrf.mxu1  ;;  %v1861_v10 = vadd.f32 %v1860_v2, %v1820_v1 }
 0x177   :  { %v1862_v4 = vpop.f32.mrf.mxu0 }
 0x178   :  { %v1903_v5 = vpop.f32.mrf.mxu1  ;;  %v1902_v8 = vadd.f32 %v1901_v43, %v1861_v10  ;;  %v1863_v53 = vadd.f32 %v1862_v4, %v1822_v44  ;;  %v2965_v44 = vcombine.high %v2566_v7, %v2566_v7  ;;  %v2148_v10 = vld [vmem:[%s3752_s4] sm:$0x3] }
 0x179   :  { %v1864_v11 = vpop.f32.mrf.mxu0  ;;  %v2153_v3 = vrot.slane %v2148_v10, %v446_v54  ;;  %v2157_v4 = vrot.slane %v2148_v10, %v450_v56  ;;  %v2964_v54 = vcombine.low %v2566_v7, %v2566_v7 }
 0x17a   :  { %v1905_v58 = vpop.f32.mrf.mxu1  ;;  %v2072_v61 = vmul.f32 0.2, %v1902_v8  ;;  %v1904_v13 = vadd.f32 %v1903_v5, %v1863_v53 }
 0x17b   :  { %v1865_v59 = vpop.f32.mrf.mxu0 }
 0x17c   :  { %v1906_v15 = vpop.f32.mrf.mxu1  ;;  %v2073_v16 = vmul.f32 0.2, %v1904_v13  ;;  %v2076_v62 = vmax.f32 %v1902_v8, %v2072_v61 }
 0x17e   :  { %v2077_v18 = vmax.f32 %v1904_v13, %v2073_v16  ;;  %v2080_v21 = vpack.c.bf16 %v2076_v62, %v2076_v62 }
 0x180   :  { %v2081_v20 = vpack.c.bf16 %v2077_v18, %v2077_v18 }
 0x182   :  { %2512 = vmatprep.mubr.bf16.mxu0 %v2081_v20 }
 0x183   :  { %2513 = vmatmul.mubr.bf16.vlgmr.msra.gmra.mxu0 %v2080_v21 }
 0x184   :  { %2608 = vmatprep.mubr.bf16.mxu0 %v2965_v44 }
 0x1b5   :  { %v1942_v24 = vpop.f32.mrf.mxu0 }
 0x1b6   :  { %v1983_v25 = vpop.f32.mrf.mxu1  ;;  %v1943_v36 = vadd.f32 %v1942_v24, %v455_v34 }
 0x1b7   :  { %v1944_v26 = vpop.f32.mrf.mxu0 }
 0x1b8   :  { %v1985_v27 = vpop.f32.mrf.mxu1  ;;  %v1945_v37 = vadd.f32 %v1944_v26, %v459_v35  ;;  %v1984_v38 = vadd.f32 %v1983_v25, %v1943_v36 }
 0x1b9   :  { %v1946_v28 = vpop.f32.mrf.mxu0 }
 0x1ba   :  { %v1987_v29 = vpop.f32.mrf.mxu1  ;;  %v1986_v41 = vadd.f32 %v1985_v27, %v1945_v37 }
 0x1bb   :  { %v1947_v30 = vpop.f32.mrf.mxu0 }
 0x1bc   :  { %v1988_v31 = vpop.f32.mrf.mxu1 }
 0x1f5   :  { %v2024_v39 = vpop.f32.mrf.mxu0 }
 0x1f6   :  { %v2065_v40 = vpop.f32.mrf.mxu1  ;;  %v2025_v42 = vadd.f32 %v2024_v39, %v1984_v38 }
 0x1f7   :  { %v2026_v45 = vpop.f32.mrf.mxu0 }
 0x1f8   :  { %v2067_v47 = vpop.f32.mrf.mxu1  ;;  %v2066_v48 = vadd.f32 %v2065_v40, %v2025_v42  ;;  %v2027_v49 = vadd.f32 %v2026_v45, %v1986_v41 }
 0x1f9   :  { %v2028_v50 = vpop.f32.mrf.mxu0 }
 0x1fa   :  { %v2069_v51 = vpop.f32.mrf.mxu1  ;;  %v2074_v52 = vmul.f32 0.2, %v2066_v48  ;;  %v2068_v57 = vadd.f32 %v2067_v47, %v2027_v49 }
 0x1fb   :  { %v2029_v60 = vpop.f32.mrf.mxu0 }
 0x1fc   :  { %v2070_v63 = vpop.f32.mrf.mxu1  ;;  %v2075_v6 = vmul.f32 0.2, %v2068_v57  ;;  %v2078_v9 = vmax.f32 %v2066_v48, %v2074_v52 }
 0x1fe   :  { %v2079_v55 = vmax.f32 %v2068_v57, %v2075_v6  ;;  %v2082_v23 = vpack.c.bf16 %v2078_v9, %v2078_v9 }
 0x200   :  { %v2083_v22 = vpack.c.bf16 %v2079_v55, %v2079_v55 }
 0x202   :  { %2553 = vmatprep.mubr.bf16.mxu1 %v2083_v22 }
 0x203   :  { %2554 = vmatmul.mubr.bf16.vlgmr.msra.gmra.mxu1 %v2082_v23 }
 0x243   :  { %v2514_v0 = vpop.f32.mrf.mxu0 }
 0x244   :  { %v2515_v5 = vadd.f32 %v2514_v0, %v2153_v3 }
 0x245   :  { %v2516_v1 = vpop.f32.mrf.mxu0 }
 0x246   :  { %v2517_v53 = vadd.f32 %v2516_v1, %v2157_v4 }
 0x247   :  { %v2518_v2 = vpop.f32.mrf.mxu0 }
 0x249   :  { %v2519_v43 = vpop.f32.mrf.mxu0 }
 0x2c3   :  { %v2555_v8 = vpop.f32.mrf.mxu1 }
 0x2c4   :  { %v2556_v11 = vadd.f32 %v2555_v8, %v2515_v5 }
 0x2c5   :  { %v2557_v58 = vpop.f32.mrf.mxu1 }
 0x2c6   :  { %v2562_v12 = vmul.f32 0.2, %v2556_v11  ;;  %v2558_v61 = vadd.f32 %v2557_v58, %v2517_v53 }
 0x2c7   :  { %v2559_v13 = vpop.f32.mrf.mxu1 }
 0x2c8   :  { %v2563_v14 = vmul.f32 0.2, %v2558_v61  ;;  %v2564_v59 = vmax.f32 %v2556_v11, %v2562_v12 }
 0x2c9   :  { %v2560_v15 = vpop.f32.mrf.mxu1 }
 0x2ca   :  { %v2565_v16 = vmax.f32 %v2558_v61, %v2563_v14  ;;  %v2567_v17 = vpack.c.bf16 %v2564_v59, %v2564_v59 }
 0x2cc   :  { %v2568_v62 = vpack.c.bf16 %v2565_v16, %v2565_v16 }
 0x2ce   :  { %2590 = vmatprep.subr.bf16.mxu0 %v2568_v62 }
 0x2cf   :  { %2591 = vmatpush1.bf16.xpose.msra.mxu0 %v2567_v17 }
 0x2d6   :  { %2609 = vmatmul.mubr.bf16.vlgmr.msra.gmra.mxu0 %v2964_v54 }
 0x396   :  { %v2610_v56 = vpop.f32.mrf.mxu0 }
 0x397   :  { %v2618_v18 = vadd.f32 %v2617_v46, %v2610_v56 }
 0x398   :  { %v2612_v19 = vpop.f32.mrf.mxu0 }
 0x399   :  { %v2966_v20 = vmul.f32 -1.442695, %v2618_v18 }
 0x39a   :  { %v2613_v21 = vpop.f32.mrf.mxu0 }
 0x39b   :  { %3471 = vpow2.f32 %v2966_v20 }
 0x39c   :  { %v2614_v24 = vpop.f32.mrf.mxu0 }
 0x3a8   :  { %v3472_v25 = vpop.eup %3471 }
 0x3a9   :  { %v2622_v26 = vadd.f32 1.0, %v3472_v25 }
 0x3ab   :  { %3473 = vrcp.f32 %v2622_v26 }
 0x3b8   :  { %v3474_v27 = vpop.eup %3473 }
 0x3b9   :  { %2626 = vst.msk [vmem:[#allocation11] sm:$0x1] %vm2625_vm0, %v3474_v27 }
 0x3ba   :  { %3566 = shalt.err (!%p3563_p10)
}
 0x3bb   :  { %2636 = dma.vmem_to_hbm [thread:$0]  %s2634_s27, 16, %s3755_s7, [#allocation5]  }
 0x3bc   :  { %3581 = dma.done.wait [#allocation5], 16  }
 0x3bd   :  { %3582 = vsyncadd [#allocation5], 4294967280 }
 0x3be   :  { %2640 = vsyncpa [#allocation4], 1 }
 0x3bf   :  { %2641 = vsyncpa [#allocation7], 1 }
 0x3c0   :  { %2642 = vsyncpa [#allocation10], 1 }
 0x3c1   :  { %2643 = vsyncpa [#allocation5], 1 }

</bundles_post_ra>
